<compile_context>
chip_gen: v5e
topology: v5e:2x2
jax: 0.10.0
libtpu: 0.0.40
codegen_flags: <defaults>
</compile_context>

<pallas_src>
import functools

import jax
import jax.numpy as jnp
import numpy as np
from jax.experimental import pallas as pl
from jax.experimental.pallas import tpu as pltpu


# ------------------------------ Pallas kernel -------------------------------

def _bn_silu(v, scale, bias):
    """Folded BatchNorm (eval stats) + SiLU, computed in f32."""
    y = v * scale + bias
    return y * jax.nn.sigmoid(y)


def _c3_kernel(x_ref, w1_ref, s1_ref, b1_ref, w2_ref, s2_ref, b2_ref,
               wb1_ref, sb1_ref, bb1_ref, wb2_ref, sb2_ref, bb2_ref,
               w3a_ref, w3b_ref, s3_ref, b3_ref, wmask_ref, o_ref,
               *, img_w, shortcut):
    cdtype = w1_ref.dtype                      # MXU input dtype (bf16 or f32)
    c_ = wb1_ref.shape[-1]
    hw = x_ref.shape[-1]
    pad = (img_w + 1 + 127) // 128 * 128       # lane-aligned zero pad >= W+1

    x = x_ref[0].astype(cdtype)                                   # (c1, HW)

    # cv1 / cv2 (1x1 conv + folded BN + SiLU).  x is read from HBM once and
    # reused from VMEM for both branches (fused cv1+cv2, no cat round-trip).
    y1 = _bn_silu(jnp.dot(w1_ref[...], x, preferred_element_type=jnp.float32),
                  s1_ref[...], b1_ref[...])                       # (c_,HW) f32
    y2 = _bn_silu(jnp.dot(w2_ref[...], x, preferred_element_type=jnp.float32),
                  s2_ref[...], b2_ref[...])                       # (c_,HW) f32

    mask_l = wmask_ref[0:1, :]       # 0 where pixel column w == 0     (kw==0)
    mask_r = wmask_ref[1:2, :]       # 0 where pixel column w == W-1   (kw==2)
    zpad = jnp.zeros((c_, pad), cdtype)

    # Bottleneck chain: 1x1 -> 3x3 (+ residual).  `t` and all 9 taps of the
    # 3x3 conv never leave VMEM (no im2col / intermediate activation in HBM).
    for i in range(wb1_ref.shape[0]):
        t = _bn_silu(jnp.dot(wb1_ref[i], y1.astype(cdtype),
                             preferred_element_type=jnp.float32),
                     sb1_ref[i], bb1_ref[i])                      # (c_,HW) f32
        tpad = jnp.concatenate([zpad, t.astype(cdtype), zpad], axis=1)
        wb2_i = wb2_ref[i]                                        # (9, c_, c_)
        acc = jnp.zeros((c_, hw), jnp.float32)
        for kh in range(3):
            for kw in range(3):
                off = (kh - 1) * img_w + (kw - 1)
                patch = tpad[:, pad + off:pad + off + hw]         # (c_, HW)
                if kw == 0:
                    patch = patch * mask_l
                elif kw == 2:
                    patch = patch * mask_r
                acc = acc + jnp.dot(wb2_i[kh * 3 + kw], patch,
                                    preferred_element_type=jnp.float32)
        z = _bn_silu(acc, sb2_ref[i], bb2_ref[i])
        y1 = y1 + z if shortcut else z            # residual after activation

    # cv3 over torch.cat([y1, y2], dim=1), written as a split matmul so the
    # concatenated tensor never materializes.
    o = (jnp.dot(w3a_ref[...], y1.astype(cdtype),
                 preferred_element_type=jnp.float32) +
         jnp.dot(w3b_ref[...], y2.astype(cdtype),
                 preferred_element_type=jnp.float32))
    o = _bn_silu(o, s3_ref[...], b3_ref[...])
    o_ref[0] = o.astype(o_ref.dtype)


# ------------------------------- wrapper -------------------------------------

def _whole_spec(arr):
    zeros = (0,) * arr.ndim
    return pl.BlockSpec(arr.shape, lambda b, _z=zeros: _z)


def _make_w_masks(h, w, dtype):
    """(2, H*W) 0/1 masks: row 0 -> pixel column > 0, row 1 -> column < W-1."""
    col = np.arange(h * w) % w
    m = np.stack([col > 0, col < w - 1]).astype(np.float32)
    return jnp.asarray(m, dtype=dtype)


def c3_forward(x_nchw, kparams, shortcut=True):
    """C3 forward (NCHW in / NCHW out) via one fused Pallas TPU kernel."""
    B, c1, H, W = x_nchw.shape
    HW = H * W
    c2 = kparams['w3a'].shape[0]
    x3 = x_nchw.reshape(B, c1, HW)                  # metadata-only reshape
    wmask = _make_w_masks(H, W, kparams['w1'].dtype)

    operands = [x3,
                kparams['w1'], kparams['s1'], kparams['b1'],
                kparams['w2'], kparams['s2'], kparams['b2'],
                kparams['wb1'], kparams['sb1'], kparams['bb1'],
                kparams['wb2'], kparams['sb2'], kparams['bb2'],
                kparams['w3a'], kparams['w3b'], kparams['s3'], kparams['b3'],
                wmask]
    in_specs = ([pl.BlockSpec((1, c1, HW), lambda b: (b, 0, 0))] +
                [_whole_spec(a) for a in operands[1:]])

    out = pl.pallas_call(
        functools.partial(_c3_kernel, img_w=W, shortcut=shortcut),
        out_shape=jax.ShapeDtypeStruct((B, c2, HW), jnp.float32),
        grid=(B,),
        in_specs=in_specs,
        out_specs=pl.BlockSpec((1, c2, HW), lambda b: (b, 0, 0)),
        compiler_params=pltpu.CompilerParams(
            dimension_semantics=("parallel",),
            vmem_limit_bytes=32 * 1024 * 1024),
    )(*operands)
    return out.reshape(B, c2, H, W)


# ----------------------- deterministic parameter init -----------------------

def make_conv_params(key, c_in, c_out, k):
    k1, k2, k3, k4, k5 = jax.random.split(key, 5)
    weight = jax.random.normal(k1, (c_out, c_in, k, k), jnp.float32) * 0.1
    gamma = jax.random.uniform(k2, (c_out,), jnp.float32, 0.5, 1.5)
    beta = jax.random.normal(k3, (c_out,), jnp.float32) * 0.1
    mean = jax.random.normal(k4, (c_out,), jnp.float32) * 0.1
    var = jax.random.uniform(k5, (c_out,), jnp.float32, 0.5, 1.5)
    eps = 1e-5                                  # nn.BatchNorm2d default
    scale = gamma / jnp.sqrt(var + eps)         # BN folded (eval-mode stats)
    bias = beta - mean * scale
    return dict(weight=weight, scale=scale, bias=bias)


def init_c3_params(key, c1, c2, n=1, e=0.5):
    c_ = int(c2 * e)
    keys = jax.random.split(key, 3 + 2 * n)
    return dict(
        cv1=make_conv_params(keys[0], c1, c_, 1),
        cv2=make_conv_params(keys[1], c1, c_, 1),
        cv3=make_conv_params(keys[2], 2 * c_, c2, 1),
        m=[dict(cv1=make_conv_params(keys[3 + 2 * i], c_, c_, 1),  # e=1.0
                cv2=make_conv_params(keys[4 + 2 * i], c_, c_, 3))
           for i in range(n)],
    )


def prepare_kernel_params(params, compute_dtype=jnp.bfloat16):
    """Pre-fold weights into the kernel's (Cout,Cin) / (9,Cout,Cin) layouts and
    pre-cast to the MXU dtype once at parameter-prep time (not per forward)."""
    c_ = params['cv1']['weight'].shape[0]
    c2 = params['cv3']['weight'].shape[0]

    def wmat(w):                                  # (Co, Ci, 1, 1) -> (Co, Ci)
        return w.reshape(w.shape[0], w.shape[1]).astype(compute_dtype)

    def col(v):                                   # (C,) -> (C, 1) f32
        return v.reshape(-1, 1).astype(jnp.float32)

    def w33(w):          # (Co, Ci, 3, 3) -> (9, Co, Ci), tap index = kh*3+kw
        return jnp.transpose(w, (2, 3, 0, 1)).reshape(
            9, w.shape[0], w.shape[1]).astype(compute_dtype)

    w3 = params['cv3']['weight'].reshape(c2, 2 * c_)
    return dict(
        w1=wmat(params['cv1']['weight']),
        s1=col(params['cv1']['scale']), b1=col(params['cv1']['bias']),
        w2=wmat(params['cv2']['weight']),
        s2=col(params['cv2']['scale']), b2=col(params['cv2']['bias']),
        wb1=jnp.stack([wmat(bp['cv1']['weight']) for bp in params['m']]),
        sb1=jnp.stack([col(bp['cv1']['scale']) for bp in params['m']]),
        bb1=jnp.stack([col(bp['cv1']['bias']) for bp in params['m']]),
        wb2=jnp.stack([w33(bp['cv2']['weight']) for bp in params['m']]),
        sb2=jnp.stack([col(bp['cv2']['scale']) for bp in params['m']]),
        bb2=jnp.stack([col(bp['cv2']['bias']) for bp in params['m']]),
        w3a=w3[:, :c_].astype(compute_dtype),
        w3b=w3[:, c_:].astype(compute_dtype),
        s3=col(params['cv3']['scale']), b3=col(params['cv3']['bias']),
    )


# --------------------------- pure-JAX reference ------------------------------

def _ref_conv(x_nhwc, weight, scale, bias, residual=None):
    k = weight.shape[-1]
    pad = k // 2
    w = jnp.transpose(weight, (2, 3, 1, 0))                 # OIHW -> HWIO
    y = jax.lax.conv_general_dilated(
        x_nhwc, w, (1, 1), [(pad, pad), (pad, pad)],
        dimension_numbers=('NHWC', 'HWIO', 'NHWC'))
    y = y * scale + bias
    y = y * jax.nn.sigmoid(y)
    if residual is not None:
        y = residual + y
    return y


def c3_ref(x_nchw, params, shortcut=True):
    x = jnp.transpose(x_nchw, (0, 2, 3, 1))
    y1 = _ref_conv(x, **params['cv1'])
    for bp in params['m']:
        t = _ref_conv(y1, **bp['cv1'])
        res = y1 if shortcut else None
        y1 = _ref_conv(t, **bp['cv2'], residual=res)
    y2 = _ref_conv(x, **params['cv2'])
    out = _ref_conv(jnp.concatenate([y1, y2], axis=-1), **params['cv3'])
    return jnp.transpose(out, (0, 3, 1, 2))


# ---------------------------------- main -------------------------------------

if __name__ == "__main__":
    key = jax.random.PRNGKey(0)
    kx, kp = jax.random.split(key)

    # Sublane/lane-friendly small shapes: c_ = c2*e = 8 (one sublane group),
    # H*W = 256 (two full lane groups).
    B, c1, c2, H, W, n = 2, 16, 16, 16, 16, 1
    x = jax.random.normal(kx, (B, c1, H, W), jnp.float32)
    params = init_c3_params(kp, c1, c2, n=n)
    ref = jax.block_until_ready(c3_ref(x, params))

    ok = True

    # f32 compute path: tight structural-correctness check of the fused kernel.
    out32 = jax.block_until_ready(
        c3_forward(x, prepare_kernel_params(params, jnp.float32)))
    err32 = float(jnp.max(jnp.abs(out32 - ref)))
    if not (out32.shape == (B, c2, H, W) and err32 < 1e-3):
        ok = False
        print(f"MISMATCH f32 max_abs_err={err32}")

    # bf16 MXU path (the performance configuration).
    outbf = jax.block_until_ready(
        c3_forward(x, prepare_kernel_params(params, jnp.bfloat16)))
    errbf = float(jnp.max(jnp.abs(outbf - ref)))
    tolbf = 2e-2 * (1.0 + float(jnp.max(jnp.abs(ref))))
    if not (outbf.shape == (B, c2, H, W) and errbf < tolbf):
        ok = False
        print(f"MISMATCH bf16 max_abs_err={errbf} tol={tolbf}")

    if ok:
        print("KERNEL_OK")
</pallas_src>

<mosaic_0001>
module attributes {stable_mosaic.version = 11 : i64} {
  func.func @_c3_kernel(%arg0: i32, %arg1: memref<1x16x256xf32, #tpu.memory_space<vmem>>, %arg2: memref<8x16xf32, #tpu.memory_space<vmem>>, %arg3: memref<8x1xf32, #tpu.memory_space<vmem>>, %arg4: memref<8x1xf32, #tpu.memory_space<vmem>>, %arg5: memref<8x16xf32, #tpu.memory_space<vmem>>, %arg6: memref<8x1xf32, #tpu.memory_space<vmem>>, %arg7: memref<8x1xf32, #tpu.memory_space<vmem>>, %arg8: memref<1x8x8xf32, #tpu.memory_space<vmem>>, %arg9: memref<1x8x1xf32, #tpu.memory_space<vmem>>, %arg10: memref<1x8x1xf32, #tpu.memory_space<vmem>>, %arg11: memref<1x9x8x8xf32, #tpu.memory_space<vmem>>, %arg12: memref<1x8x1xf32, #tpu.memory_space<vmem>>, %arg13: memref<1x8x1xf32, #tpu.memory_space<vmem>>, %arg14: memref<16x8xf32, #tpu.memory_space<vmem>>, %arg15: memref<16x8xf32, #tpu.memory_space<vmem>>, %arg16: memref<16x1xf32, #tpu.memory_space<vmem>>, %arg17: memref<16x1xf32, #tpu.memory_space<vmem>>, %arg18: memref<2x256xf32, #tpu.memory_space<vmem>>, %arg19: memref<1x16x256xf32, #tpu.memory_space<vmem>>) attributes {dimension_semantics = [#tpu.dimension_semantics<parallel>], iteration_bounds = array<i64: 2>, scalar_prefetch = 0 : i64, scratch_operands = 0 : i64, tpu.core_type = #tpu.core_type<tc>, window_params = [{transform_indices = @transform_0, window_bounds = array<i64: 1, 16, 256>}, {pipeline_mode = #tpu.pipeline_mode<synchronous>, transform_indices = @transform_1, window_bounds = array<i64: 8, 16>}, {pipeline_mode = #tpu.pipeline_mode<synchronous>, transform_indices = @transform_2, window_bounds = array<i64: 8, 1>}, {pipeline_mode = #tpu.pipeline_mode<synchronous>, transform_indices = @transform_3, window_bounds = array<i64: 8, 1>}, {pipeline_mode = #tpu.pipeline_mode<synchronous>, transform_indices = @transform_4, window_bounds = array<i64: 8, 16>}, {pipeline_mode = #tpu.pipeline_mode<synchronous>, transform_indices = @transform_5, window_bounds = array<i64: 8, 1>}, {pipeline_mode = #tpu.pipeline_mode<synchronous>, transform_indices = @transform_6, window_bounds = array<i64: 8, 1>}, {pipeline_mode = #tpu.pipeline_mode<synchronous>, transform_indices = @transform_7, window_bounds = array<i64: 1, 8, 8>}, {pipeline_mode = #tpu.pipeline_mode<synchronous>, transform_indices = @transform_8, window_bounds = array<i64: 1, 8, 1>}, {pipeline_mode = #tpu.pipeline_mode<synchronous>, transform_indices = @transform_9, window_bounds = array<i64: 1, 8, 1>}, {pipeline_mode = #tpu.pipeline_mode<synchronous>, transform_indices = @transform_10, window_bounds = array<i64: 1, 9, 8, 8>}, {pipeline_mode = #tpu.pipeline_mode<synchronous>, transform_indices = @transform_11, window_bounds = array<i64: 1, 8, 1>}, {pipeline_mode = #tpu.pipeline_mode<synchronous>, transform_indices = @transform_12, window_bounds = array<i64: 1, 8, 1>}, {pipeline_mode = #tpu.pipeline_mode<synchronous>, transform_indices = @transform_13, window_bounds = array<i64: 16, 8>}, {pipeline_mode = #tpu.pipeline_mode<synchronous>, transform_indices = @transform_14, window_bounds = array<i64: 16, 8>}, {pipeline_mode = #tpu.pipeline_mode<synchronous>, transform_indices = @transform_15, window_bounds = array<i64: 16, 1>}, {pipeline_mode = #tpu.pipeline_mode<synchronous>, transform_indices = @transform_16, window_bounds = array<i64: 16, 1>}, {pipeline_mode = #tpu.pipeline_mode<synchronous>, transform_indices = @transform_17, window_bounds = array<i64: 2, 256>}, {transform_indices = @transform_18, window_bounds = array<i64: 1, 16, 256>}]} {
    %c0 = arith.constant 0 : index
    %c0_0 = arith.constant 0 : index
    %c0_1 = arith.constant 0 : index
    %0 = vector.load %arg1[%c0, %c0_0, %c0_1] : memref<1x16x256xf32, #tpu.memory_space<vmem>>, vector<1x16x256xf32>
    %1 = vector.shape_cast %0 : vector<1x16x256xf32> to vector<16x256xf32>
    %c0_2 = arith.constant 0 : index
    %c0_3 = arith.constant 0 : index
    %2 = vector.load %arg2[%c0_2, %c0_3] : memref<8x16xf32, #tpu.memory_space<vmem>>, vector<8x16xf32>
    %cst = arith.constant dense<0.000000e+00> : vector<8x256xf32>
    %3 = tpu.matmul %2, %1, %cst {dimension_numbers = #tpu.dot_dimension_numbers<[1], [0], [0], [1], [0, 0, 1, 1], [], []>} : vector<8x16xf32>, vector<16x256xf32>, vector<8x256xf32> -> vector<8x256xf32>
    %c0_4 = arith.constant 0 : index
    %c0_5 = arith.constant 0 : index
    %4 = vector.load %arg3[%c0_4, %c0_5] : memref<8x1xf32, #tpu.memory_space<vmem>>, vector<8x1xf32>
    %c0_6 = arith.constant 0 : index
    %c0_7 = arith.constant 0 : index
    %5 = vector.load %arg4[%c0_6, %c0_7] : memref<8x1xf32, #tpu.memory_space<vmem>>, vector<8x1xf32>
    %6 = vector.broadcast %4 : vector<8x1xf32> to vector<8x256xf32>
    %7 = arith.mulf %3, %6 : vector<8x256xf32>
    %8 = vector.broadcast %5 : vector<8x1xf32> to vector<8x256xf32>
    %9 = arith.addf %7, %8 : vector<8x256xf32>
    %10 = arith.negf %9 : vector<8x256xf32>
    %11 = math.exp %10 : vector<8x256xf32>
    %cst_8 = arith.constant 1.000000e+00 : f32
    %12 = vector.broadcast %cst_8 : f32 to vector<8x256xf32>
    %13 = arith.addf %12, %11 : vector<8x256xf32>
    %14 = arith.divf %12, %13 : vector<8x256xf32>
    %15 = arith.mulf %9, %14 : vector<8x256xf32>
    %c0_9 = arith.constant 0 : index
    %c0_10 = arith.constant 0 : index
    %16 = vector.load %arg5[%c0_9, %c0_10] : memref<8x16xf32, #tpu.memory_space<vmem>>, vector<8x16xf32>
    %cst_11 = arith.constant dense<0.000000e+00> : vector<8x256xf32>
    %17 = tpu.matmul %16, %1, %cst_11 {dimension_numbers = #tpu.dot_dimension_numbers<[1], [0], [0], [1], [0, 0, 1, 1], [], []>} : vector<8x16xf32>, vector<16x256xf32>, vector<8x256xf32> -> vector<8x256xf32>
    %c0_12 = arith.constant 0 : index
    %c0_13 = arith.constant 0 : index
    %18 = vector.load %arg6[%c0_12, %c0_13] : memref<8x1xf32, #tpu.memory_space<vmem>>, vector<8x1xf32>
    %c0_14 = arith.constant 0 : index
    %c0_15 = arith.constant 0 : index
    %19 = vector.load %arg7[%c0_14, %c0_15] : memref<8x1xf32, #tpu.memory_space<vmem>>, vector<8x1xf32>
    %20 = vector.broadcast %18 : vector<8x1xf32> to vector<8x256xf32>
    %21 = arith.mulf %17, %20 : vector<8x256xf32>
    %22 = vector.broadcast %19 : vector<8x1xf32> to vector<8x256xf32>
    %23 = arith.addf %21, %22 : vector<8x256xf32>
    %24 = arith.negf %23 : vector<8x256xf32>
    %25 = math.exp %24 : vector<8x256xf32>
    %cst_16 = arith.constant 1.000000e+00 : f32
    %26 = vector.broadcast %cst_16 : f32 to vector<8x256xf32>
    %27 = arith.addf %26, %25 : vector<8x256xf32>
    %28 = arith.divf %26, %27 : vector<8x256xf32>
    %29 = arith.mulf %23, %28 : vector<8x256xf32>
    %c0_17 = arith.constant 0 : index
    %c0_18 = arith.constant 0 : index
    %30 = vector.load %arg18[%c0_17, %c0_18] : memref<2x256xf32, #tpu.memory_space<vmem>>, vector<1x256xf32>
    %c1 = arith.constant 1 : index
    %c0_19 = arith.constant 0 : index
    %31 = vector.load %arg18[%c1, %c0_19] : memref<2x256xf32, #tpu.memory_space<vmem>>, vector<1x256xf32>
    %cst_20 = arith.constant 0.000000e+00 : f32
    %32 = vector.broadcast %cst_20 : f32 to vector<8x128xf32>
    %c0_21 = arith.constant 0 : index
    %c0_22 = arith.constant 0 : index
    %c0_23 = arith.constant 0 : index
    %33 = vector.load %arg8[%c0_21, %c0_22, %c0_23] : memref<1x8x8xf32, #tpu.memory_space<vmem>>, vector<1x8x8xf32>
    %34 = vector.shape_cast %33 : vector<1x8x8xf32> to vector<8x8xf32>
    %cst_24 = arith.constant dense<0.000000e+00> : vector<8x256xf32>
    %35 = tpu.matmul %34, %15, %cst_24 {dimension_numbers = #tpu.dot_dimension_numbers<[1], [0], [0], [1], [0, 0, 1, 1], [], []>} : vector<8x8xf32>, vector<8x256xf32>, vector<8x256xf32> -> vector<8x256xf32>
    %c0_25 = arith.constant 0 : index
    %c0_26 = arith.constant 0 : index
    %c0_27 = arith.constant 0 : index
    %36 = vector.load %arg9[%c0_25, %c0_26, %c0_27] : memref<1x8x1xf32, #tpu.memory_space<vmem>>, vector<1x8x1xf32>
    %37 = vector.shape_cast %36 : vector<1x8x1xf32> to vector<8x1xf32>
    %c0_28 = arith.constant 0 : index
    %c0_29 = arith.constant 0 : index
    %c0_30 = arith.constant 0 : index
    %38 = vector.load %arg10[%c0_28, %c0_29, %c0_30] : memref<1x8x1xf32, #tpu.memory_space<vmem>>, vector<1x8x1xf32>
    %39 = vector.shape_cast %38 : vector<1x8x1xf32> to vector<8x1xf32>
    %40 = vector.broadcast %37 : vector<8x1xf32> to vector<8x256xf32>
    %41 = arith.mulf %35, %40 : vector<8x256xf32>
    %42 = vector.broadcast %39 : vector<8x1xf32> to vector<8x256xf32>
    %43 = arith.addf %41, %42 : vector<8x256xf32>
    %44 = arith.negf %43 : vector<8x256xf32>
    %45 = math.exp %44 : vector<8x256xf32>
    %cst_31 = arith.constant 1.000000e+00 : f32
    %46 = vector.broadcast %cst_31 : f32 to vector<8x256xf32>
    %47 = arith.addf %46, %45 : vector<8x256xf32>
    %48 = arith.divf %46, %47 : vector<8x256xf32>
    %49 = arith.mulf %43, %48 : vector<8x256xf32>
    %50 = tpu.concatenate %32, %49, %32 in 1 : vector<8x128xf32>, vector<8x256xf32>, vector<8x128xf32> -> vector<8x512xf32>
    %c0_32 = arith.constant 0 : index
    %c0_33 = arith.constant 0 : index
    %c0_34 = arith.constant 0 : index
    %c0_35 = arith.constant 0 : index
    %51 = vector.load %arg11[%c0_32, %c0_33, %c0_34, %c0_35] : memref<1x9x8x8xf32, #tpu.memory_space<vmem>>, vector<1x9x8x8xf32>
    %52 = vector.shape_cast %51 : vector<1x9x8x8xf32> to vector<9x8x8xf32>
    %cst_36 = arith.constant 0.000000e+00 : f32
    %53 = vector.broadcast %cst_36 : f32 to vector<8x256xf32>
    %54 = vector.extract_strided_slice %50 {offsets = [0, 111], sizes = [8, 256], strides = [1, 1]} : vector<8x512xf32> to vector<8x256xf32>
    %55 = vector.broadcast %30 : vector<1x256xf32> to vector<8x256xf32>
    %56 = arith.mulf %54, %55 : vector<8x256xf32>
    %57 = vector.extract_strided_slice %52 {offsets = [0, 0, 0], sizes = [1, 8, 8], strides = [1, 1, 1]} : vector<9x8x8xf32> to vector<1x8x8xf32>
    %58 = vector.shape_cast %57 : vector<1x8x8xf32> to vector<8x8xf32>
    %cst_37 = arith.constant dense<0.000000e+00> : vector<8x256xf32>
    %59 = tpu.matmul %58, %56, %cst_37 {dimension_numbers = #tpu.dot_dimension_numbers<[1], [0], [0], [1], [0, 0, 1, 1], [], []>} : vector<8x8xf32>, vector<8x256xf32>, vector<8x256xf32> -> vector<8x256xf32>
    %60 = arith.addf %53, %59 : vector<8x256xf32>
    %61 = vector.extract_strided_slice %50 {offsets = [0, 112], sizes = [8, 256], strides = [1, 1]} : vector<8x512xf32> to vector<8x256xf32>
    %62 = vector.extract_strided_slice %52 {offsets = [1, 0, 0], sizes = [1, 8, 8], strides = [1, 1, 1]} : vector<9x8x8xf32> to vector<1x8x8xf32>
    %63 = vector.shape_cast %62 : vector<1x8x8xf32> to vector<8x8xf32>
    %cst_38 = arith.constant dense<0.000000e+00> : vector<8x256xf32>
    %64 = tpu.matmul %63, %61, %cst_38 {dimension_numbers = #tpu.dot_dimension_numbers<[1], [0], [0], [1], [0, 0, 1, 1], [], []>} : vector<8x8xf32>, vector<8x256xf32>, vector<8x256xf32> -> vector<8x256xf32>
    %65 = arith.addf %60, %64 : vector<8x256xf32>
    %66 = vector.extract_strided_slice %50 {offsets = [0, 113], sizes = [8, 256], strides = [1, 1]} : vector<8x512xf32> to vector<8x256xf32>
    %67 = vector.broadcast %31 : vector<1x256xf32> to vector<8x256xf32>
    %68 = arith.mulf %66, %67 : vector<8x256xf32>
    %69 = vector.extract_strided_slice %52 {offsets = [2, 0, 0], sizes = [1, 8, 8], strides = [1, 1, 1]} : vector<9x8x8xf32> to vector<1x8x8xf32>
    %70 = vector.shape_cast %69 : vector<1x8x8xf32> to vector<8x8xf32>
    %cst_39 = arith.constant dense<0.000000e+00> : vector<8x256xf32>
    %71 = tpu.matmul %70, %68, %cst_39 {dimension_numbers = #tpu.dot_dimension_numbers<[1], [0], [0], [1], [0, 0, 1, 1], [], []>} : vector<8x8xf32>, vector<8x256xf32>, vector<8x256xf32> -> vector<8x256xf32>
    %72 = arith.addf %65, %71 : vector<8x256xf32>
    %73 = vector.extract_strided_slice %50 {offsets = [0, 127], sizes = [8, 256], strides = [1, 1]} : vector<8x512xf32> to vector<8x256xf32>
    %74 = vector.broadcast %30 : vector<1x256xf32> to vector<8x256xf32>
    %75 = arith.mulf %73, %74 : vector<8x256xf32>
    %76 = vector.extract_strided_slice %52 {offsets = [3, 0, 0], sizes = [1, 8, 8], strides = [1, 1, 1]} : vector<9x8x8xf32> to vector<1x8x8xf32>
    %77 = vector.shape_cast %76 : vector<1x8x8xf32> to vector<8x8xf32>
    %cst_40 = arith.constant dense<0.000000e+00> : vector<8x256xf32>
    %78 = tpu.matmul %77, %75, %cst_40 {dimension_numbers = #tpu.dot_dimension_numbers<[1], [0], [0], [1], [0, 0, 1, 1], [], []>} : vector<8x8xf32>, vector<8x256xf32>, vector<8x256xf32> -> vector<8x256xf32>
    %79 = arith.addf %72, %78 : vector<8x256xf32>
    %80 = vector.extract_strided_slice %50 {offsets = [0, 128], sizes = [8, 256], strides = [1, 1]} : vector<8x512xf32> to vector<8x256xf32>
    %81 = vector.extract_strided_slice %52 {offsets = [4, 0, 0], sizes = [1, 8, 8], strides = [1, 1, 1]} : vector<9x8x8xf32> to vector<1x8x8xf32>
    %82 = vector.shape_cast %81 : vector<1x8x8xf32> to vector<8x8xf32>
    %cst_41 = arith.constant dense<0.000000e+00> : vector<8x256xf32>
    %83 = tpu.matmul %82, %80, %cst_41 {dimension_numbers = #tpu.dot_dimension_numbers<[1], [0], [0], [1], [0, 0, 1, 1], [], []>} : vector<8x8xf32>, vector<8x256xf32>, vector<8x256xf32> -> vector<8x256xf32>
    %84 = arith.addf %79, %83 : vector<8x256xf32>
    %85 = vector.extract_strided_slice %50 {offsets = [0, 129], sizes = [8, 256], strides = [1, 1]} : vector<8x512xf32> to vector<8x256xf32>
    %86 = vector.broadcast %31 : vector<1x256xf32> to vector<8x256xf32>
    %87 = arith.mulf %85, %86 : vector<8x256xf32>
    %88 = vector.extract_strided_slice %52 {offsets = [5, 0, 0], sizes = [1, 8, 8], strides = [1, 1, 1]} : vector<9x8x8xf32> to vector<1x8x8xf32>
    %89 = vector.shape_cast %88 : vector<1x8x8xf32> to vector<8x8xf32>
    %cst_42 = arith.constant dense<0.000000e+00> : vector<8x256xf32>
    %90 = tpu.matmul %89, %87, %cst_42 {dimension_numbers = #tpu.dot_dimension_numbers<[1], [0], [0], [1], [0, 0, 1, 1], [], []>} : vector<8x8xf32>, vector<8x256xf32>, vector<8x256xf32> -> vector<8x256xf32>
    %91 = arith.addf %84, %90 : vector<8x256xf32>
    %92 = vector.extract_strided_slice %50 {offsets = [0, 143], sizes = [8, 256], strides = [1, 1]} : vector<8x512xf32> to vector<8x256xf32>
    %93 = vector.broadcast %30 : vector<1x256xf32> to vector<8x256xf32>
    %94 = arith.mulf %92, %93 : vector<8x256xf32>
    %95 = vector.extract_strided_slice %52 {offsets = [6, 0, 0], sizes = [1, 8, 8], strides = [1, 1, 1]} : vector<9x8x8xf32> to vector<1x8x8xf32>
    %96 = vector.shape_cast %95 : vector<1x8x8xf32> to vector<8x8xf32>
    %cst_43 = arith.constant dense<0.000000e+00> : vector<8x256xf32>
    %97 = tpu.matmul %96, %94, %cst_43 {dimension_numbers = #tpu.dot_dimension_numbers<[1], [0], [0], [1], [0, 0, 1, 1], [], []>} : vector<8x8xf32>, vector<8x256xf32>, vector<8x256xf32> -> vector<8x256xf32>
    %98 = arith.addf %91, %97 : vector<8x256xf32>
    %99 = vector.extract_strided_slice %50 {offsets = [0, 144], sizes = [8, 256], strides = [1, 1]} : vector<8x512xf32> to vector<8x256xf32>
    %100 = vector.extract_strided_slice %52 {offsets = [7, 0, 0], sizes = [1, 8, 8], strides = [1, 1, 1]} : vector<9x8x8xf32> to vector<1x8x8xf32>
    %101 = vector.shape_cast %100 : vector<1x8x8xf32> to vector<8x8xf32>
    %cst_44 = arith.constant dense<0.000000e+00> : vector<8x256xf32>
    %102 = tpu.matmul %101, %99, %cst_44 {dimension_numbers = #tpu.dot_dimension_numbers<[1], [0], [0], [1], [0, 0, 1, 1], [], []>} : vector<8x8xf32>, vector<8x256xf32>, vector<8x256xf32> -> vector<8x256xf32>
    %103 = arith.addf %98, %102 : vector<8x256xf32>
    %104 = vector.extract_strided_slice %50 {offsets = [0, 145], sizes = [8, 256], strides = [1, 1]} : vector<8x512xf32> to vector<8x256xf32>
    %105 = vector.broadcast %31 : vector<1x256xf32> to vector<8x256xf32>
    %106 = arith.mulf %104, %105 : vector<8x256xf32>
    %107 = vector.extract_strided_slice %52 {offsets = [8, 0, 0], sizes = [1, 8, 8], strides = [1, 1, 1]} : vector<9x8x8xf32> to vector<1x8x8xf32>
    %108 = vector.shape_cast %107 : vector<1x8x8xf32> to vector<8x8xf32>
    %cst_45 = arith.constant dense<0.000000e+00> : vector<8x256xf32>
    %109 = tpu.matmul %108, %106, %cst_45 {dimension_numbers = #tpu.dot_dimension_numbers<[1], [0], [0], [1], [0, 0, 1, 1], [], []>} : vector<8x8xf32>, vector<8x256xf32>, vector<8x256xf32> -> vector<8x256xf32>
    %110 = arith.addf %103, %109 : vector<8x256xf32>
    %c0_46 = arith.constant 0 : index
    %c0_47 = arith.constant 0 : index
    %c0_48 = arith.constant 0 : index
    %111 = vector.load %arg12[%c0_46, %c0_47, %c0_48] : memref<1x8x1xf32, #tpu.memory_space<vmem>>, vector<1x8x1xf32>
    %112 = vector.shape_cast %111 : vector<1x8x1xf32> to vector<8x1xf32>
    %c0_49 = arith.constant 0 : index
    %c0_50 = arith.constant 0 : index
    %c0_51 = arith.constant 0 : index
    %113 = vector.load %arg13[%c0_49, %c0_50, %c0_51] : memref<1x8x1xf32, #tpu.memory_space<vmem>>, vector<1x8x1xf32>
    %114 = vector.shape_cast %113 : vector<1x8x1xf32> to vector<8x1xf32>
    %115 = vector.broadcast %112 : vector<8x1xf32> to vector<8x256xf32>
    %116 = arith.mulf %110, %115 : vector<8x256xf32>
    %117 = vector.broadcast %114 : vector<8x1xf32> to vector<8x256xf32>
    %118 = arith.addf %116, %117 : vector<8x256xf32>
    %119 = arith.negf %118 : vector<8x256xf32>
    %120 = math.exp %119 : vector<8x256xf32>
    %cst_52 = arith.constant 1.000000e+00 : f32
    %121 = vector.broadcast %cst_52 : f32 to vector<8x256xf32>
    %122 = arith.addf %121, %120 : vector<8x256xf32>
    %123 = arith.divf %121, %122 : vector<8x256xf32>
    %124 = arith.mulf %118, %123 : vector<8x256xf32>
    %125 = arith.addf %15, %124 : vector<8x256xf32>
    %c0_53 = arith.constant 0 : index
    %c0_54 = arith.constant 0 : index
    %126 = vector.load %arg14[%c0_53, %c0_54] : memref<16x8xf32, #tpu.memory_space<vmem>>, vector<16x8xf32>
    %cst_55 = arith.constant dense<0.000000e+00> : vector<16x256xf32>
    %127 = tpu.matmul %126, %125, %cst_55 {dimension_numbers = #tpu.dot_dimension_numbers<[1], [0], [0], [1], [0, 0, 1, 1], [], []>} : vector<16x8xf32>, vector<8x256xf32>, vector<16x256xf32> -> vector<16x256xf32>
    %c0_56 = arith.constant 0 : index
    %c0_57 = arith.constant 0 : index
    %128 = vector.load %arg15[%c0_56, %c0_57] : memref<16x8xf32, #tpu.memory_space<vmem>>, vector<16x8xf32>
    %cst_58 = arith.constant dense<0.000000e+00> : vector<16x256xf32>
    %129 = tpu.matmul %128, %29, %cst_58 {dimension_numbers = #tpu.dot_dimension_numbers<[1], [0], [0], [1], [0, 0, 1, 1], [], []>} : vector<16x8xf32>, vector<8x256xf32>, vector<16x256xf32> -> vector<16x256xf32>
    %130 = arith.addf %127, %129 : vector<16x256xf32>
    %c0_59 = arith.constant 0 : index
    %c0_60 = arith.constant 0 : index
    %131 = vector.load %arg16[%c0_59, %c0_60] : memref<16x1xf32, #tpu.memory_space<vmem>>, vector<16x1xf32>
    %c0_61 = arith.constant 0 : index
    %c0_62 = arith.constant 0 : index
    %132 = vector.load %arg17[%c0_61, %c0_62] : memref<16x1xf32, #tpu.memory_space<vmem>>, vector<16x1xf32>
    %133 = vector.broadcast %131 : vector<16x1xf32> to vector<16x256xf32>
    %134 = arith.mulf %130, %133 : vector<16x256xf32>
    %135 = vector.broadcast %132 : vector<16x1xf32> to vector<16x256xf32>
    %136 = arith.addf %134, %135 : vector<16x256xf32>
    %137 = arith.negf %136 : vector<16x256xf32>
    %138 = math.exp %137 : vector<16x256xf32>
    %cst_63 = arith.constant 1.000000e+00 : f32
    %139 = vector.broadcast %cst_63 : f32 to vector<16x256xf32>
    %140 = arith.addf %139, %138 : vector<16x256xf32>
    %141 = arith.divf %139, %140 : vector<16x256xf32>
    %142 = arith.mulf %136, %141 : vector<16x256xf32>
    %c0_64 = arith.constant 0 : index
    %c0_65 = arith.constant 0 : index
    %c0_66 = arith.constant 0 : index
    %143 = vector.load %arg19[%c0_64, %c0_65, %c0_66] : memref<1x16x256xf32, #tpu.memory_space<vmem>>, vector<1x16x256xf32>
    %144 = vector.shape_cast %143 : vector<1x16x256xf32> to vector<16x256xf32>
    %145 = vector.shape_cast %142 : vector<16x256xf32> to vector<1x16x256xf32>
    tpu.vector_store %arg19[%c0_64, %c0_65, %c0_66], %145 {strides = array<i32>} : memref<1x16x256xf32, #tpu.memory_space<vmem>>, vector<1x16x256xf32>,
    return
  }
  func.func @transform_0(%arg0: i32) -> (i32, i32, i32) {
    %c0_i32 = arith.constant 0 : i32
    %c0_i32_0 = arith.constant 0 : i32
    %c0_i32_1 = arith.constant 0 : i32
    return %arg0, %c0_i32, %c0_i32_0 : i32, i32, i32
  }
  func.func @transform_1(%arg0: i32) -> (i32, i32) {
    %c0_i32 = arith.constant 0 : i32
    %c0_i32_0 = arith.constant 0 : i32
    %c0_i32_1 = arith.constant 0 : i32
    return %c0_i32, %c0_i32_0 : i32, i32
  }
  func.func @transform_2(%arg0: i32) -> (i32, i32) {
    %c0_i32 = arith.constant 0 : i32
    %c0_i32_0 = arith.constant 0 : i32
    %c0_i32_1 = arith.constant 0 : i32
    return %c0_i32, %c0_i32_0 : i32, i32
  }
  func.func @transform_3(%arg0: i32) -> (i32, i32) {
    %c0_i32 = arith.constant 0 : i32
    %c0_i32_0 = arith.constant 0 : i32
    %c0_i32_1 = arith.constant 0 : i32
    return %c0_i32, %c0_i32_0 : i32, i32
  }
  func.func @transform_4(%arg0: i32) -> (i32, i32) {
    %c0_i32 = arith.constant 0 : i32
    %c0_i32_0 = arith.constant 0 : i32
    %c0_i32_1 = arith.constant 0 : i32
    return %c0_i32, %c0_i32_0 : i32, i32
  }
  func.func @transform_5(%arg0: i32) -> (i32, i32) {
    %c0_i32 = arith.constant 0 : i32
    %c0_i32_0 = arith.constant 0 : i32
    %c0_i32_1 = arith.constant 0 : i32
    return %c0_i32, %c0_i32_0 : i32, i32
  }
  func.func @transform_6(%arg0: i32) -> (i32, i32) {
    %c0_i32 = arith.constant 0 : i32
    %c0_i32_0 = arith.constant 0 : i32
    %c0_i32_1 = arith.constant 0 : i32
    return %c0_i32, %c0_i32_0 : i32, i32
  }
  func.func @transform_7(%arg0: i32) -> (i32, i32, i32) {
    %c0_i32 = arith.constant 0 : i32
    %c0_i32_0 = arith.constant 0 : i32
    %c0_i32_1 = arith.constant 0 : i32
    %c0_i32_2 = arith.constant 0 : i32
    return %c0_i32, %c0_i32_0, %c0_i32_1 : i32, i32, i32
  }
  func.func @transform_8(%arg0: i32) -> (i32, i32, i32) {
    %c0_i32 = arith.constant 0 : i32
    %c0_i32_0 = arith.constant 0 : i32
    %c0_i32_1 = arith.constant 0 : i32
    %c0_i32_2 = arith.constant 0 : i32
    return %c0_i32, %c0_i32_0, %c0_i32_1 : i32, i32, i32
  }
  func.func @transform_9(%arg0: i32) -> (i32, i32, i32) {
    %c0_i32 = arith.constant 0 : i32
    %c0_i32_0 = arith.constant 0 : i32
    %c0_i32_1 = arith.constant 0 : i32
    %c0_i32_2 = arith.constant 0 : i32
    return %c0_i32, %c0_i32_0, %c0_i32_1 : i32, i32, i32
  }
  func.func @transform_10(%arg0: i32) -> (i32, i32, i32, i32) {
    %c0_i32 = arith.constant 0 : i32
    %c0_i32_0 = arith.constant 0 : i32
    %c0_i32_1 = arith.constant 0 : i32
    %c0_i32_2 = arith.constant 0 : i32
    %c0_i32_3 = arith.constant 0 : i32
    return %c0_i32, %c0_i32_0, %c0_i32_1, %c0_i32_2 : i32, i32, i32, i32
  }
  func.func @transform_11(%arg0: i32) -> (i32, i32, i32) {
    %c0_i32 = arith.constant 0 : i32
    %c0_i32_0 = arith.constant 0 : i32
    %c0_i32_1 = arith.constant 0 : i32
    %c0_i32_2 = arith.constant 0 : i32
    return %c0_i32, %c0_i32_0, %c0_i32_1 : i32, i32, i32
  }
  func.func @transform_12(%arg0: i32) -> (i32, i32, i32) {
    %c0_i32 = arith.constant 0 : i32
    %c0_i32_0 = arith.constant 0 : i32
    %c0_i32_1 = arith.constant 0 : i32
    %c0_i32_2 = arith.constant 0 : i32
    return %c0_i32, %c0_i32_0, %c0_i32_1 : i32, i32, i32
  }
  func.func @transform_13(%arg0: i32) -> (i32, i32) {
    %c0_i32 = arith.constant 0 : i32
    %c0_i32_0 = arith.constant 0 : i32
    %c0_i32_1 = arith.constant 0 : i32
    return %c0_i32, %c0_i32_0 : i32, i32
  }
  func.func @transform_14(%arg0: i32) -> (i32, i32) {
    %c0_i32 = arith.constant 0 : i32
    %c0_i32_0 = arith.constant 0 : i32
    %c0_i32_1 = arith.constant 0 : i32
    return %c0_i32, %c0_i32_0 : i32, i32
  }
  func.func @transform_15(%arg0: i32) -> (i32, i32) {
    %c0_i32 = arith.constant 0 : i32
    %c0_i32_0 = arith.constant 0 : i32
    %c0_i32_1 = arith.constant 0 : i32
    return %c0_i32, %c0_i32_0 : i32, i32
  }
  func.func @transform_16(%arg0: i32) -> (i32, i32) {
    %c0_i32 = arith.constant 0 : i32
    %c0_i32_0 = arith.constant 0 : i32
    %c0_i32_1 = arith.constant 0 : i32
    return %c0_i32, %c0_i32_0 : i32, i32
  }
  func.func @transform_17(%arg0: i32) -> (i32, i32) {
    %c0_i32 = arith.constant 0 : i32
    %c0_i32_0 = arith.constant 0 : i32
    %c0_i32_1 = arith.constant 0 : i32
    return %c0_i32, %c0_i32_0 : i32, i32
  }
  func.func @transform_18(%arg0: i32) -> (i32, i32, i32) {
    %c0_i32 = arith.constant 0 : i32
    %c0_i32_0 = arith.constant 0 : i32
    %c0_i32_1 = arith.constant 0 : i32
    return %arg0, %c0_i32, %c0_i32_0 : i32, i32, i32
  }
}

</mosaic_0001>

<bundles_post_ra>
// kernel: tpu_custom_call.1
= control target key start
LH: loop header
LB: loop body
LE: loop exit
PB: predicated region body
PF: predicated region fallthrough
CT: control target
= control target key end

     0   :  { %s2536_s0 = inlined_call_operand.vmem [shape: f32[2,16,256], index: 0, kind: input, shape index: {}]   ;;  %s2537_s1 = inlined_call_operand.vmem [shape: f32[8,16], index: 1, kind: input, shape index: {}]   ;;  %s2538_s2 = inlined_call_operand.vmem [shape: f32[8,1], index: 2, kind: input, shape index: {}]   ;;  %s2539_s3 = inlined_call_operand.vmem [shape: f32[8,1], index: 3, kind: input, shape index: {}]   ;;  %s2540_s4 = inlined_call_operand.vmem [shape: f32[8,16], index: 4, kind: input, shape index: {}]   ;;  %s2541_s5 = inlined_call_operand.vmem [shape: f32[8,1], index: 5, kind: input, shape index: {}]   ;;  %s2542_s6 = inlined_call_operand.vmem [shape: f32[8,1], index: 6, kind: input, shape index: {}]   ;;  %s2543_s7 = inlined_call_operand.vmem [shape: f32[1,8,8], index: 7, kind: input, shape index: {}]   ;;  %s2544_s8 = inlined_call_operand.vmem [shape: f32[1,8,1], index: 8, kind: input, shape index: {}]   ;;  %s2545_s9 = inlined_call_operand.vmem [shape: f32[1,8,1], index: 9, kind: input, shape index: {}]   ;;  %s2546_s10 = inlined_call_operand.vmem [shape: f32[1,9,8,8], index: 10, kind: input, shape index: {}]   ;;  %s2547_s11 = inlined_call_operand.vmem [shape: f32[1,8,1], index: 11, kind: input, shape index: {}]   ;;  %s2548_s12 = inlined_call_operand.vmem [shape: f32[1,8,1], index: 12, kind: input, shape index: {}]   ;;  %s2549_s13 = inlined_call_operand.vmem [shape: f32[16,8], index: 13, kind: input, shape index: {}]   ;;  %s2550_s14 = inlined_call_operand.vmem [shape: f32[16,8], index: 14, kind: input, shape index: {}]   ;;  %s2551_s15 = inlined_call_operand.vmem [shape: f32[16,1], index: 15, kind: input, shape index: {}]   ;;  %s2552_s16 = inlined_call_operand.vmem [shape: f32[16,1], index: 16, kind: input, shape index: {}]   ;;  %s2553_s17 = inlined_call_operand.vmem [shape: f32[2,256], index: 17, kind: input, shape index: {}]   ;;  %s2554_s18 = inlined_call_operand.hbm [shape: f32[2,16,256], index: 18, kind: output, shape index: {}]  }
   0x1   :  { %2561 = sst [smem:[#allocation10_spill]] %s2536_s0 }
   0x2   :  { %2562 = sst [smem:[#allocation11_spill]] %s2537_s1 }
   0x3   :  { %2563 = sst [smem:[#allocation12_spill]] %s2538_s2 }
   0x4   :  { %2564 = sst [smem:[#allocation13_spill]] %s2539_s3 }
   0x5   :  { %2565 = sst [smem:[#allocation14_spill]] %s2540_s4 }
   0x6   :  { %23 = vsyncpa [#allocation3], 0 }
   0x7   :  { %25 = vsyncpa [#allocation3 + $0x1], 0  ;;  %s2203_s27 = smov 0   ;;  %s2205_s28 = smov 0  }
   0x8   :  { %s2207_s29 = smov 0   ;;  %s2209_s30 = smov 0  }
   0x9 LB: > { %2566 = sst [smem:[#allocation5_spill]] %s2083_s27  ;;  %s2224_s0 = sadd.s32 4294967295, %s2095_s30   ;;  %s2095_s30 = sphi %s2209_s30, %s2581_s30   ;;  %s2091_s29 = sphi %s2207_s29, %s2583_s29   ;;  %s2087_s28 = sphi %s2205_s28, %s2585_s28   ;;  %s2083_s27 = sphi %s2203_s27, %s2584_s27  }
   0xa   : > { %2567 = sst [smem:[#allocation6_spill]] %s2091_s29  ;;  %s1833_s19 = sadd.s32 4294967294, %s2095_s30  }
   0xb   : > { %s2228_s1 = sadd.s32 1, %s2095_s30   ;;  %s421_s20 = sadd.s32 1, %s2091_s29 }
   0xc   : > { %2568 = sst [smem:[#allocation7_spill]] %s2228_s1  ;;  %s418_s21 = ssub.s32 %s2095_s30, %s2228_s1 }
   0xd   : > { %p431_p0 = scmp.ne.s32.totalorder %s2091_s29, %s2087_s28  ;;  %p419_p1 = scmp.eq.s32.totalorder %s418_s21, 0 }
   0xe   : > { %p432_p2 = scmp.eq.s32.totalorder %s2224_s0, 1  ;;  %p437_p3 = scmp.ne.s32.totalorder %s2087_s28, %s2083_s27 }
   0xf   : > { %p438_p4 = scmp.eq.s32.totalorder %s1833_s19, 1  ;;  %p1836_p7 = scmp.ge.s32.totalorder %s2095_s30, 1 }
  0x10   : > { %s2239_s22 = scalar_select %p419_p1, %s2091_s29, %s421_s20  }
  0x11   : > { %p2241_p5 = por %p432_p2, %p431_p0  ;;  %p2245_p6 = por %p438_p4, %p437_p3 }
  0x12   : > { %2569 = sst [smem:[#allocation8_spill]] %s2239_s22  ;;  %p515_p8 = scmp.lt.s32.totalorder %s2095_s30, 3 }
  0x13   : > { %s2571_s23 = scalar_select %p2245_p6, 1, 0 }
  0x14   : > { %p516_p9 = pnand %p1836_p7, %p515_p8 }
  0x15   : > { %2572 = sst [smem:[#allocation9_spill]] %s2571_s23  ;;  %p569_p10 = scmp.lt.s32.totalorder (!%p516_p9), %s2224_s0, 1 }
  0x16   : > { %519 = sbr.rel (%p516_p9) target bundleno = 867 (0x363), region = 92  ;;  %s2573_s26 = sld [smem:[#allocation12_spill]] (!%p516_p9) }
  0x17   : > { %s2574_s29 = sld [smem:[#allocation10_spill]] (!%p516_p9)  ;;  %s2098_s24 = smov (!%p516_p9), 111  }
  0x18   : > { %s2576_s3 = sld [smem:[#allocation13_spill]] (!%p516_p9)  ;;  %s2099_s25 = smov (!%p516_p9), 113  }
  0x19   : > { %s2103_s23 = smov (!%p516_p9), 17   ;;  %s2577_s4 = sld [smem:[#allocation14_spill]] (!%p516_p9) }
  0x1a   : > { %s2560_s21 = smov (!%p516_p9), 16  }
  0x1b   : > { %v2097_v1 = vmov 0   ;;  %s570_s19 = scalar_select %p569_p10, %s2224_s0, 1  ;;  %vm579_vm0 = vcmask 130048   ;;  %v827_v8 = vld [vmem:[%s2544_s8] sm:$0xff]  ;;  %vm783_vm9 = vcmask 64512  }
  0x1c   : > { %v623_v0 = vld [vmem:[%s2573_s26] sm:$0xff]  ;;  %1942 = vset.pattern.permute.xlu0 %v2097_v1  ;;  %1943 = vset.pattern.permute.xlu1 %v2097_v1  ;;  %s2575_s26 = sld [smem:[#allocation11_spill]] }
  0x1d   : > { %627 = vperm.xlu0 %1942, %v623_v0   ;;  %1984 = vset.pattern.permute.xlu2 %v2097_v1  ;;  %s1890_s20 = sshll.u32 %s570_s19, 5  ;;  %v828_v19 = vld [vmem:[%s2545_s9] sm:$0xff] }
  0x1e   : > { %s573_s1 = scalar_lea.vmem %s2574_s29, %s1890_s20  ;;  %v624_v7 = vld [vmem:[%s2576_s3] sm:$0xff]  ;;  %831 = vperm.xlu1 %1943, %v827_v8   ;;  %s2101_s29 = smov 15  }
  0x1f   : > { %v576_v2 = vld [vmem:[%s573_s1 + $0x10] sm:$0xff]  ;;  %v577_v3 = vld [vmem:[%s573_s1 + $0x18] sm:$0xff]  ;;  %v574_v4 = vld [vmem:[%s573_s1] sm:$0xff]  ;;  %s566_s20 = sand.u32 1, %s2087_s28  }
  0x20   : > { %597 = vmatpush.msra.mxu0 %v576_v2  ;;  %617 = vmatpush.msra.mxu1 %v577_v3  ;;  %v575_v5 = vld [vmem:[%s573_s1 + $0x8] sm:$0xff]  ;;  %v779_v20 = vld [vmem:[%s2553_s17] ss:$2 sm:$0x3]  ;;  %s2102_s1 = smov 1  }
  0x21   : > { %697 = vmatpush.msra.mxu2 %v576_v2  ;;  %717 = vmatpush.msra.mxu3 %v577_v3  ;;  %v1848_v21 = vld [vmem:[%s2553_s17 + $0x1] ss:$2 sm:$0x3]  ;;  %v893_v22 = vperm.slane %v779_v20, 0  ;;  %v894_v24 = vperm.slane %v779_v20, 1 }
  0x22   : > { %v578_v6 = vld [vmem:[%s2575_s26] sm:$0xff]  ;;  %598 = vmatpush.msra.mxu0 %v574_v4  ;;  %618 = vmatpush.msra.mxu1 %v575_v5  ;;  %v2282_v23 = vperm.slane %v1848_v21, 0  ;;  %v1022_v26 = vperm.slane %v1848_v21, 1  ;;  %s2100_s26 = smov 127  }
  0x23   : > { %1840 = vmatmul.msk.f32.vlgmr.msra.gmra.mxu0 %vm579_vm0, %v578_v6  ;;  %1841 = vmatmul.msk.f32.vlgmr.msra.gmra.mxu1 %vm579_vm0, %v578_v6  ;;  %v782_v51 = vld [vmem:[%s2543_s7] sm:$0xff] }
  0x24   : > { %698 = vmatpush.msra.mxu2 %v574_v4  ;;  %718 = vmatpush.msra.mxu3 %v575_v5 }
  0x25   : > { %634 = vperm.xlu0 %1942, %v624_v7   ;;  %1023 = vrot.lane.b32.xlu2 %v2282_v23, %s2099_s25 }
  0x26   : > { %838 = vperm.xlu1 %1943, %v828_v19  }
  0x2d   : > { %895 = vrot.lane.b32.xlu0 %v893_v22, %s2098_s24  ;;  %1025 = vrot.lane.b32.xlu2 %v1022_v26, %s2099_s25 }
  0x2e   : > { %897 = vrot.lane.b32.xlu1 %v894_v24, %s2098_s24 }
  0x35   : > { %1096 = vrot.lane.b32.xlu0 %v894_v24, %s2100_s26  ;;  %1094 = vrot.lane.b32.xlu2 %v893_v22, %s2100_s26 }
  0x36   : > { %1279 = vrot.lane.b32.xlu1 %v893_v22, %s2101_s29 }
  0x3d   : > { %1210 = vrot.lane.b32.xlu0 %v2282_v23, %s2102_s1  ;;  %1281 = vrot.lane.b32.xlu2 %v894_v24, %s2101_s29 }
  0x3e   : > { %1212 = vrot.lane.b32.xlu1 %v1022_v26, %s2102_s1 }
  0x45   : > { %1406 = vrot.lane.b32.xlu0 %v1022_v26, %s2103_s23  ;;  %1404 = vrot.lane.b32.xlu2 %v2282_v23, %s2103_s23  ;;  %v679_v26 = vld [vmem:[%s2577_s4] sm:$0xff] }
  0x46   : > { %1844 = vmatmul.msk.f32.vlgmr.msra.gmra.mxu2 %vm579_vm0, %v679_v26  ;;  %1845 = vmatmul.msk.f32.vlgmr.msra.gmra.mxu3 %vm579_vm0, %v679_v26 }
  0x7f   : > { %v1024_v3 = vpop.permute.xlu2 %1023 }
  0x8f   : > { %v628_v9 = vpop.permute.xlu0 %627 }
  0x90   : > { %v832_v53 = vpop.permute.xlu1 %831 }
  0x97   : > { %v635_v14 = vpop.permute.xlu0 %634 }
  0x98   : > { %v839_v57 = vpop.permute.xlu1 %838 }
  0x9f   : > { %v896_v21 = vpop.permute.xlu0 %895 }
  0xa0   : > { %v600_v10 = vpop.f32.mrf.mxu0  ;;  %v620_v11 = vpop.f32.mrf.mxu1 }
  0xa1   : > { %v630_v12 = vmul.f32 %v628_v9, %v600_v10  ;;  %v631_v13 = vmul.f32 %v628_v9, %v620_v11  ;;  %v1026_v11 = vpop.permute.xlu2 %1025 }
  0xa3   : > { %v637_v15 = vadd.f32 %v635_v14, %v630_v12  ;;  %v2270_v16 = vadd.f32 %v635_v14, %v631_v13 }
  0xa5   : > { %v1842_v17 = vmul.f32 -1.442695, %v637_v15  ;;  %v1843_v18 = vmul.f32 -1.442695, %v2270_v16 }
  0xa7   : > { %1985 = vpow2.f32 %v1842_v17  ;;  %v898_v17 = vpop.permute.xlu1 %897 }
  0xa8   : > { %1987 = vpow2.f32 %v1843_v18 }
  0xad   : > { %v1986_v25 = vpop.eup %1985 }
  0xae   : > { %v1988_v27 = vpop.eup %1987  ;;  %v645_v28 = vadd.f32 1.0, %v1986_v25 }
  0xaf   : > { %v646_v29 = vadd.f32 1.0, %v1988_v27 }
  0xb0   : > { %1989 = vrcp.f32 %v645_v28  ;;  %v658_v35 = vand.u32 2147483648, %v645_v28  ;;  %v656_v38 = vand.u32 2147483647, %v645_v28  ;;  %vm652_vm3 = vweird.f32 %v645_v28 }
  0xb1   : > { %1991 = vrcp.f32 %v646_v29  ;;  %v673_v39 = vand.u32 2147483648, %v646_v29  ;;  %v671_v41 = vand.u32 2147483647, %v646_v29  ;;  %vm667_vm5 = vweird.f32 %v646_v29 }
  0xb2   : > { %v659_v43 = vor.u32 1.1754944e-38, %v658_v35  ;;  %vm657_vm6 = vcmp.eq.f32.partialorder %v656_v38, 8.507059e+37  ;;  %v904_v35 = vmul.f32 0.0, %v896_v21  ;;  %v2105_v38 = vmov 0.0  }
  0xb3   : > { %v674_v46 = vor.u32 1.1754944e-38, %v673_v39  ;;  %vm672_vm8 = vcmp.eq.f32.partialorder %v671_v41, 8.507059e+37  ;;  %v1097_v41 = vpop.permute.xlu0 %1096 }
  0xb6   : > { %v1990_v30 = vpop.eup %1989 }
  0xb7   : > { %v1992_v31 = vpop.eup %1991  ;;  %v648_v32 = vmul.f32 %v1990_v30, %v645_v28  ;;  %vm653_vm1 = vweird.f32 %v1990_v30 }
  0xb8   : > { %v663_v33 = vmul.f32 %v1992_v31, %v646_v29  ;;  %vm668_vm2 = vweird.f32 %v1992_v31  ;;  %vm654_vm4 = vmor %vm652_vm3, %vm653_vm1 }
  0xb9   : > { %v649_v34 = vsub.f32 1.0, %v648_v32  ;;  %vm669_vm7 = vmor %vm667_vm5, %vm668_vm2  ;;  %vm1027_vm2 = vcmask 924672   ;;  %vm1044_vm5 = vcmask 121856  }
  0xba   : > { %v664_v36 = vsub.f32 1.0, %v663_v33  ;;  %v1032_v33 = vmul.f32 0.0, %v1024_v3 }
  0xbb   : > { %v650_v37 = vmul.f32 %v1990_v30, %v649_v34  ;;  %v1095_v34 = vpop.permute.xlu2 %1094 }
  0xbc   : > { %v665_v40 = vmul.f32 %v1992_v31, %v664_v36 }
  0xbd   : > { %v651_v42 = vadd.f32 %v1990_v30, %v650_v37  ;;  %v1280_v37 = vpop.permute.xlu1 %1279 }
  0xbe   : > { %v666_v44 = vadd.f32 %v1992_v31, %v665_v40 }
  0xbf   : > { %v655_v45 = vsel %vm654_vm4, %v1990_v30, %v651_v42  ;;  %vm899_vm4 = vcmask 908288   ;;  %v1028_v30 = vsel %vm1027_vm2, %v1024_v3, %v1026_v11 }
  0xc0   : > { %v660_v47 = vsel %vm657_vm6, %v659_v43, %v655_v45  ;;  %v670_v48 = vsel %vm669_vm7, %v1992_v31, %v666_v44  ;;  %v900_v32 = vsel %vm899_vm4, %v896_v21, %v898_v17  ;;  %vm1115_vm6 = vcmask 7168  }
  0xc1   : > { %v2295_v49 = vmul.f32 %v660_v47, %v637_v15  ;;  %v675_v50 = vsel %vm672_vm8, %v674_v46, %v670_v48  ;;  %vm1098_vm7 = vcmask 1039360   ;;  %vm972_vm8 = vcmask 138240  }
  0xc2   : > { %v2303_v52 = vmul.f32 %v675_v50, %v2270_v16 }
  0xc3   : > { %802 = vmatpush.msrb.mxu0 %v2295_v49  ;;  %v1282_v45 = vpop.permute.xlu2 %1281 }
  0xc4   : > { %822 = vmatpush.msrb.mxu1 %v2303_v52  ;;  %1849 = vmatmul.msk.f32.vlgmr.msrb.gmra.mxu0 %vm783_vm9, %v782_v51  ;;  %v1283_v46 = vsel %vm1044_vm5, %v1280_v37, %v1282_v45 }
  0xc5   : > { %1850 = vmatmul.msk.f32.vlgmr.msrb.gmra.mxu1 %vm783_vm9, %v782_v51  ;;  %v1213_v47 = vpop.permute.xlu1 %1212 }
 0x141   : > { %v804_v54 = vpop.f32.mrf.mxu0 }
 0x142   : > { %v834_v55 = vmul.f32 %v832_v53, %v804_v54  ;;  %v824_v56 = vpop.f32.mrf.mxu1 }
 0x143   : > { %v835_v58 = vmul.f32 %v832_v53, %v824_v56  ;;  %v1211_v53 = vpop.permute.xlu0 %1210 }
 0x144   : > { %v841_v59 = vadd.f32 %v839_v57, %v834_v55  ;;  %v1214_v54 = vsel %vm1115_vm6, %v1211_v53, %v1213_v47  ;;  %v1289_v55 = vmul.f32 0.0, %v1282_v45 }
 0x145   : > { %v842_v60 = vadd.f32 %v839_v57, %v835_v58 }
 0x146   : > { %v1851_v61 = vmul.f32 -1.442695, %v841_v59 }
 0x147   : > { %v1852_v62 = vmul.f32 -1.442695, %v842_v60 }
 0x148   : > { %1993 = vpow2.f32 %v1851_v61 }
 0x149   : > { %1995 = vpow2.f32 %v1852_v62 }
 0x14e   : > { %v1994_v63 = vpop.eup %1993 }
 0x14f   : > { %v1996_v0 = vpop.eup %1995  ;;  %v849_v1 = vadd.f32 1.0, %v1994_v63  ;;  %v1405_v63 = vpop.permute.xlu2 %1404 }
 0x150   : > { %v850_v2 = vadd.f32 1.0, %v1996_v0  ;;  %v1220_v0 = vmul.f32 0.0, %v1213_v47 }
 0x151   : > { %1997 = vrcp.f32 %v849_v1  ;;  %v862_v9 = vand.u32 2147483648, %v849_v1  ;;  %v860_v13 = vand.u32 2147483647, %v849_v1  ;;  %vm856_vm12 = vweird.f32 %v849_v1 }
 0x152   : > { %1999 = vrcp.f32 %v850_v2  ;;  %v877_v14 = vand.u32 2147483648, %v850_v2  ;;  %v875_v16 = vand.u32 2147483647, %v850_v2  ;;  %vm871_vm14 = vweird.f32 %v850_v2 }
 0x153   : > { %v863_v19 = vor.u32 1.1754944e-38, %v862_v9  ;;  %vm861_vm15 = vcmp.eq.f32.partialorder %v860_v13, 8.507059e+37  ;;  %v1473_v9 = vld [vmem:[%s2547_s11] sm:$0xff] }
 0x154   : > { %v878_v23 = vor.u32 1.1754944e-38, %v877_v14  ;;  %vm876_vm3 = vcmp.eq.f32.partialorder %v875_v16, 8.507059e+37  ;;  %v1639_v13 = vld [vmem:[%s2551_s15] sm:$0xff]  ;;  %v1640_v14 = vld [vmem:[%s2551_s15 + $0x8] sm:$0xff] }
 0x157   : > { %v1998_v4 = vpop.eup %1997 }
 0x158   : > { %v2000_v5 = vpop.eup %1999  ;;  %v852_v6 = vmul.f32 %v1998_v4, %v849_v1  ;;  %vm857_vm10 = vweird.f32 %v1998_v4  ;;  %v1407_v1 = vpop.permute.xlu0 %1406 }
 0x159   : > { %v867_v7 = vmul.f32 %v2000_v5, %v850_v2  ;;  %vm872_vm11 = vweird.f32 %v2000_v5  ;;  %vm858_vm13 = vmor %vm856_vm12, %vm857_vm10  ;;  %v1408_v3 = vsel %vm972_vm8, %v1405_v63, %v1407_v1 }
 0x15a   : > { %v853_v8 = vsub.f32 1.0, %v852_v6  ;;  %vm873_vm1 = vmor %vm871_vm14, %vm872_vm11 }
 0x15b   : > { %v868_v10 = vsub.f32 1.0, %v867_v7 }
 0x15c   : > { %v854_v12 = vmul.f32 %v1998_v4, %v853_v8 }
 0x15d   : > { %v869_v15 = vmul.f32 %v2000_v5, %v868_v10  ;;  %v1474_v10 = vld [vmem:[%s2548_s12] sm:$0xff] }
 0x15e   : > { %v855_v18 = vadd.f32 %v1998_v4, %v854_v12  ;;  %v723_v12 = vld [vmem:[%s2541_s5] sm:$0xff] }
 0x15f   : > { %v870_v20 = vadd.f32 %v2000_v5, %v869_v15  ;;  %v1642_v15 = vld [vmem:[%s2552_s16 + $0x8] sm:$0xff] }
 0x160   : > { %v859_v22 = vsel %vm858_vm13, %v1998_v4, %v855_v18  ;;  %v1414_v4 = vmul.f32 0.0, %v1407_v1 }
 0x161   : > { %v864_v24 = vsel %vm861_vm15, %v863_v19, %v859_v22  ;;  %v874_v25 = vsel %vm873_vm1, %v2000_v5, %v870_v20  ;;  %v883_v20 = vld [vmem:[%s2546_s10] sm:$0xff] }
 0x162   : > { %v2314_v27 = vmul.f32 %v864_v24, %v841_v59  ;;  %v879_v28 = vsel %vm876_vm3, %v878_v23, %v874_v25  ;;  %v1099_v59 = vsel %vm1098_vm7, %v1095_v34, %v1097_v41 }
 0x163   : > { %v2318_v29 = vmul.f32 %v879_v28, %v842_v60  ;;  %v1103_v60 = vmul.f32 0.0, %v1095_v34 }
 0x164   : > { %v1033_v31 = vmul.f32 %v1028_v30, %v2314_v27  ;;  %v905_v36 = vmul.f32 %v900_v32, %v2314_v27  ;;  %v1944_v39 = vpack.i.bf16 %v2314_v27, %v2105_v38  ;;  %v1287_v50 = vmul.f32 %v1280_v37, %v2314_v27  ;;  %v884_v30 = vld [vmem:[%s2546_s10 + $0x8] sm:$0xff] }
 0x165   : > { %914 = vrot.lane.b32.xlu2 %v2318_v29, %s2560_s21  ;;  %v1034_v43 = vmul.f32 %v1026_v11, %v2318_v29  ;;  %v906_v44 = vmul.f32 %v898_v17, %v2318_v29  ;;  %v1105_v48 = vmul.f32 %v1097_v41, %v2318_v29  ;;  %v1288_v51 = vmul.f32 %v1283_v46, %v2318_v29  ;;  %v724_v11 = vld [vmem:[%s2542_s6] sm:$0xff] }
 0x166   : > { %v1949_v40 = vpack.i.bf16 %v1033_v31, %v1032_v33  ;;  %1945 = vrot.lane.b32.xlu1 %v1944_v39, %s2560_s21  ;;  %v1954_v42 = vpack.i.bf16 %v905_v36, %v904_v35  ;;  %v1218_v57 = vmul.f32 %v1211_v53, %v2314_v27  ;;  %v1219_v58 = vmul.f32 %v1214_v54, %v2318_v29  ;;  %v885_v39 = vld [vmem:[%s2546_s10 + $0x10] sm:$0xff]  ;;  %v886_v54 = vld [vmem:[%s2546_s10 + $0x18] sm:$0xff] }
 0x167   : > { %v1964_v56 = vpack.i.bf16 %v1288_v51, %v1287_v50  ;;  %v1104_v61 = vmul.f32 %v1099_v59, %v2314_v27  ;;  %v1412_v5 = vmul.f32 %v1405_v63, %v2314_v27  ;;  %v1413_v6 = vmul.f32 %v1408_v3, %v2318_v29  ;;  %v888_v3 = vld [vmem:[%s2546_s10 + $0x28] sm:$0xff] }
 0x168   : > { %1950 = vrot.lane.b32.xlu0 %v1949_v40, %s2101_s29  ;;  %v1969_v62 = vpack.i.bf16 %v1219_v58, %v1218_v57  ;;  %v1974_v8 = vpack.i.bf16 %v2318_v29, %v2314_v27  ;;  %v889_v58 = vld [vmem:[%s2546_s10 + $0x30] sm:$0xff] }
 0x169   : > { %v1959_v2 = vpack.i.bf16 %v1104_v61, %v1103_v60  ;;  %v1979_v7 = vpack.i.bf16 %v1413_v6, %v1412_v5 }
 0x16d   : > { %1955 = vrot.lane.b32.xlu2 %v1954_v42, %s2103_s23 }
 0x16e   : > { %1042 = vrot.lane.b32.xlu1 %v1034_v43, %s2101_s29  ;;  %v887_v43 = vld [vmem:[%s2546_s10 + $0x20] sm:$0xff]  ;;  %s1837_s29 = sshll.u32 %s566_s20, 5 }
 0x16f   : > { %s2490_s27 = scalar_lea.vmem [#allocation2], %s1837_s29 }
 0x170   : > { %970 = vrot.lane.b32.xlu0 %v906_v44, %s2103_s23  ;;  %s1756_s23 = scalar_lea.sflag [#allocation3], %s566_s20 }
 0x175   : > { %1113 = vrot.lane.b32.xlu2 %v1105_v48, %s2102_s1 }
 0x176   : > { %1297 = vrot.lane.b32.xlu1 %v1289_v55, %s2099_s25 }
 0x178   : > { %1965 = vrot.lane.b32.xlu0 %v1964_v56, %s2099_s25  ;;  %s2106_s25 = smov 112  }
 0x17d   : > { %1970 = vrot.lane.b32.xlu2 %v1969_v62, %s2100_s26 }
 0x17e   : > { %1960 = vrot.lane.b32.xlu1 %v1959_v2, %s2102_s1 }
 0x180   : > { %1228 = vrot.lane.b32.xlu0 %v1220_v0, %s2100_s26  ;;  %s2053_s26 = scalar_lea.hbm %s2554_s18, 64 }
 0x185   : > { %1422 = vrot.lane.b32.xlu2 %v1414_v4, %s2098_s24 }
 0x186   : > { %1980 = vrot.lane.b32.xlu1 %v1979_v7, %s2098_s24  ;;  %v891_v7 = vld [vmem:[%s2546_s10 + $0x40] sm:$0xff] }
 0x188   : > { %1975 = vrot.lane.b32.xlu0 %v1974_v8, %s2106_s25 }
 0x18d   : > { %1477 = vperm.xlu2 %1984, %v1473_v9  }
 0x18e   : > { %1352 = vrot.lane.b32.xlu1 %v2105_v38, %s2106_s25  ;;  %s1891_s25 = sshll.u32 %s2224_s0, 5  ;;  %s1768_s0 = sshll.u32 %s2490_s27, 4  ;;  %s1769_s0 = int_to_ptr.vmem [resolvable:$true] %s1768_s0 }
 0x18f   : > { %s1767_s22 = scalar_lea.hbm %s2554_s18, %s1891_s25 }
 0x190   : > { %1484 = vperm.xlu0 %1942, %v1474_v10   ;;  %s1770_s21 = sshll.u32 %s1767_s22, 4  ;;  %s1771_s21 = int_to_ptr.hbm [resolvable:$true] %s1770_s21 }
 0x191   : > { %s2047_s19 = sshra.s32 %s1771_s21, 4  ;;  %s2048_s19 = int_to_ptr.hbm [resolvable:$true] %s2047_s19 }
 0x192   : > { %s2049_s24 = scalar_lea.hbm %s2048_s19, 32  ;;  %p2054_p0 = scmp.lt.s32.totalorder %s2048_s19, %s2554_s18 }
 0x193   : > { %p2050_p11 = scmp.ne.s32.totalorder %s2048_s19, %s2049_s24  ;;  %p2055_p1 = scmp.lt.s32.totalorder %s2053_s26, %s2049_s24 }
 0x195   : > { %734 = vperm.xlu2 %1984, %v724_v11   ;;  %v890_v11 = vld [vmem:[%s2546_s10 + $0x38] sm:$0xff]  ;;  %p2051_p12 = pnand %p2050_p11, %p2241_p5  ;;  %p2056_p2 = por %p2055_p1, %p2054_p0 }
 0x196   : > { %727 = vperm.xlu1 %1943, %v723_v12   ;;  %v700_v12 = vpop.f32.mrf.mxu2 }
 0x197   : > { %p2052_p13 = pneg %p2051_p12 }
 0x198   : > { %1645 = vperm.xlu0 %1942, %v1639_v13   ;;  %v720_v13 = vpop.f32.mrf.mxu3 }
 0x199   : > { %p2057_p3 = pnand %p2056_p2, %p2052_p13 }
 0x19e   : > { %1650 = vperm.xlu1 %1943, %v1640_v14  }
 0x1a0   : > { %1664 = vperm.xlu0 %1942, %v1642_v15  }
 0x1bf   : > { %v915_v16 = vpop.permute.xlu2 %914 }
 0x1c7   : > { %v1956_v17 = vpop.permute.xlu2 %1955 }
 0x1c8   : > { %v1958_v18 = vunpack.i.h.bf16 %v1956_v17  ;;  %v1957_v19 = vunpack.i.l.bf16 %v1956_v17 }
 0x1ca   : > { %v973_v21 = vsel %vm972_vm8, %v1957_v19, %v1958_v18 }
 0x1cb   : > { %995 = vmatpush.msra.mxu0 %v973_v21 }
 0x1cc   : > { %1855 = vmatmul.msk.f32.vlgmr.msra.gmra.mxu0 %vm783_vm9, %v883_v20 }
 0x1cf   : > { %v1114_v38 = vpop.permute.xlu2 %1113 }
 0x1d7   : > { %v1971_v46 = vpop.permute.xlu2 %1970 }
 0x1d8   : > { %v1946_v22 = vpop.permute.xlu1 %1945  ;;  %v1973_v48 = vunpack.i.h.bf16 %v1971_v46  ;;  %v1972_v50 = vunpack.i.l.bf16 %v1971_v46 }
 0x1d9   : > { %v1948_v24 = vunpack.i.h.bf16 %v1946_v22  ;;  %v1947_v25 = vunpack.i.l.bf16 %v1946_v22 }
 0x1da   : > { %v1951_v23 = vpop.permute.xlu0 %1950  ;;  %v1230_v59 = vsel %vm1098_vm7, %v1972_v50, %v1973_v48 }
 0x1db   : > { %v1953_v26 = vunpack.i.h.bf16 %v1951_v23  ;;  %v1952_v28 = vunpack.i.l.bf16 %v1951_v23  ;;  %v916_v31 = vsel %vm579_vm0, %v1947_v25, %v1948_v24  ;;  %v917_v32 = vsel %vm579_vm0, %v1948_v24, %v915_v16 }
 0x1dc   : > { %938 = vmatpush.msrb.mxu2 %v916_v31  ;;  %958 = vmatpush.msrb.mxu3 %v917_v32  ;;  %vm1354_vm0 = vcmask 916480  }
 0x1dd   : > { %v1045_v33 = vsel %vm1044_vm5, %v1952_v28, %v1953_v26  ;;  %1853 = vmatmul.msk.f32.vlgmr.msrb.gmra.mxu2 %vm783_vm9, %v884_v30  ;;  %1854 = vmatmul.msk.f32.vlgmr.msrb.gmra.mxu3 %vm783_vm9, %v884_v30 }
 0x1de   : > { %1067 = vmatpush.msra.mxu2 %v1045_v33 }
 0x1df   : > { %v1423_v60 = vpop.permute.xlu2 %1422 }
 0x1e0   : > { %1183 = vmatpush.msrb.mxu2 %v2314_v27  ;;  %v1043_v34 = vpop.permute.xlu1 %1042 }
 0x1e1   : > { %v1046_v36 = vsel %vm1044_vm5, %v1953_v26, %v1043_v34 }
 0x1e2   : > { %v971_v35 = vpop.permute.xlu0 %970  ;;  %1087 = vmatpush.msra.mxu3 %v1046_v36 }
 0x1e3   : > { %v974_v37 = vsel %vm972_vm8, %v1958_v18, %v971_v35 }
 0x1e4   : > { %1015 = vmatpush.msra.mxu1 %v974_v37  ;;  %1203 = vmatpush.msrb.mxu3 %v2318_v29 }
 0x1e5   : > { %1856 = vmatmul.msk.f32.vlgmr.msra.gmra.mxu1 %vm783_vm9, %v883_v20  ;;  %1857 = vmatmul.msk.f32.vlgmr.msra.gmra.mxu2 %vm783_vm9, %v885_v39  ;;  %v1641_v20 = vld [vmem:[%s2552_s16] sm:$0xff] }
 0x1e6   : > { %1858 = vmatmul.msk.f32.vlgmr.msra.gmra.mxu3 %vm783_vm9, %v885_v39  ;;  %1659 = vperm.xlu2 %1984, %v1641_v20  }
 0x1e7   : > { %v2432_v8 = vpop.permute.xlu2 %1477 }
 0x1e8   : > { %v1298_v27 = vpop.permute.xlu1 %1297 }
 0x1ea   : > { %v1966_v40 = vpop.permute.xlu0 %1965 }
 0x1eb   : > { %v1968_v41 = vunpack.i.h.bf16 %v1966_v40  ;;  %v1967_v42 = vunpack.i.l.bf16 %v1966_v40 }
 0x1ed   : > { %v1299_v44 = vsel %vm1027_vm2, %v1967_v42, %v1968_v41  ;;  %v1300_v45 = vsel %vm1027_vm2, %v1968_v41, %v1298_v27  ;;  %1861 = vmatmul.msk.f32.vlgmr.msrb.gmra.mxu2 %vm783_vm9, %v887_v43 }
 0x1ee   : > { %1321 = vmatpush.msra.mxu2 %v1299_v44  ;;  %1341 = vmatpush.msra.mxu3 %v1300_v45 }
 0x1ef   : > { %1862 = vmatmul.msk.f32.vlgmr.msrb.gmra.mxu3 %vm783_vm9, %v887_v43  ;;  %v735_v15 = vpop.permute.xlu2 %734 }
 0x1f0   : > { %v1961_v29 = vpop.permute.xlu1 %1960 }
 0x1f1   : > { %v1963_v51 = vunpack.i.h.bf16 %v1961_v29  ;;  %v1962_v53 = vunpack.i.l.bf16 %v1961_v29 }
 0x1f2   : > { %v1229_v47 = vpop.permute.xlu0 %1228 }
 0x1f3   : > { %v1231_v55 = vsel %vm1098_vm7, %v1973_v48, %v1229_v47  ;;  %v1116_v56 = vsel %vm1115_vm6, %v1962_v53, %v1963_v51  ;;  %v1117_v57 = vsel %vm1115_vm6, %v1963_v51, %v1114_v38 }
 0x1f4   : > { %1138 = vmatpush.msrb.mxu0 %v1116_v56  ;;  %1158 = vmatpush.msrb.mxu1 %v1117_v57 }
 0x1f5   : > { %1859 = vmatmul.msk.f32.vlgmr.msrb.gmra.mxu0 %vm783_vm9, %v886_v54  ;;  %1860 = vmatmul.msk.f32.vlgmr.msrb.gmra.mxu1 %vm783_vm9, %v886_v54 }
 0x1f6   : > { %1252 = vmatpush.msra.mxu0 %v1230_v59  ;;  %1272 = vmatpush.msra.mxu1 %v1231_v55 }
 0x1f7   : > { %1865 = vmatmul.msk.f32.vlgmr.msra.gmra.mxu2 %vm783_vm9, %v889_v58  ;;  %1866 = vmatmul.msk.f32.vlgmr.msra.gmra.mxu3 %vm783_vm9, %v889_v58 }
 0x1f8   : > { %v1981_v61 = vpop.permute.xlu1 %1980 }
 0x1f9   : > { %v1983_v63 = vunpack.i.h.bf16 %v1981_v61  ;;  %v1982_v0 = vunpack.i.l.bf16 %v1981_v61 }
 0x1fa   : > { %v1976_v62 = vpop.permute.xlu0 %1975 }
 0x1fb   : > { %v1978_v1 = vunpack.i.h.bf16 %v1976_v62  ;;  %v1977_v2 = vunpack.i.l.bf16 %v1976_v62  ;;  %v1424_v4 = vsel %vm899_vm4, %v1982_v0, %v1983_v63  ;;  %v1425_v5 = vsel %vm899_vm4, %v1983_v63, %v1423_v60 }
 0x1fc   : > { %1446 = vmatpush.msrb.mxu2 %v1424_v4  ;;  %1466 = vmatpush.msrb.mxu3 %v1425_v5 }
 0x1fd   : > { %v1355_v6 = vsel %vm1354_vm0, %v1977_v2, %v1978_v1  ;;  %1863 = vmatmul.msk.f32.vlgmr.msra.gmra.mxu0 %vm783_vm9, %v888_v3  ;;  %1864 = vmatmul.msk.f32.vlgmr.msra.gmra.mxu1 %vm783_vm9, %v888_v3 }
 0x1fe   : > { %1377 = vmatpush.msrb.mxu0 %v1355_v6 }
 0x1ff   : > { %1869 = vmatmul.msk.f32.vlgmr.msrb.gmra.mxu2 %vm783_vm9, %v891_v7  ;;  %1870 = vmatmul.msk.f32.vlgmr.msrb.gmra.mxu3 %vm783_vm9, %v891_v7 }
 0x200   : > { %v1353_v9 = vpop.permute.xlu1 %1352 }
 0x201   : > { %v1356_v10 = vsel %vm1354_vm0, %v1978_v1, %v1353_v9 }
 0x202   : > { %1397 = vmatpush.msrb.mxu1 %v1356_v10 }
 0x205   : > { %1867 = vmatmul.msk.f32.vlgmr.msrb.gmra.mxu0 %vm783_vm9, %v890_v11  ;;  %1868 = vmatmul.msk.f32.vlgmr.msrb.gmra.mxu1 %vm783_vm9, %v890_v11 }
 0x208   : > { %v728_v14 = vpop.permute.xlu1 %727 }
 0x209   : > { %v730_v16 = vmul.f32 %v728_v14, %v700_v12  ;;  %v731_v17 = vmul.f32 %v728_v14, %v720_v13 }
 0x20b   : > { %v737_v18 = vadd.f32 %v735_v15, %v730_v16  ;;  %v738_v19 = vadd.f32 %v735_v15, %v731_v17 }
 0x20d   : > { %v1846_v21 = vmul.f32 -1.442695, %v737_v18  ;;  %v1847_v22 = vmul.f32 -1.442695, %v738_v19 }
 0x20f   : > { %2001 = vpow2.f32 %v1846_v21 }
 0x210   : > { %2003 = vpow2.f32 %v1847_v22 }
 0x215   : > { %v2002_v23 = vpop.eup %2001 }
 0x216   : > { %v2004_v24 = vpop.eup %2003  ;;  %v745_v25 = vadd.f32 1.0, %v2002_v23 }
 0x217   : > { %v746_v26 = vadd.f32 1.0, %v2004_v24  ;;  %v1485_v24 = vpop.permute.xlu0 %1484 }
 0x218   : > { %2005 = vrcp.f32 %v745_v25  ;;  %v758_v34 = vand.u32 2147483648, %v745_v25  ;;  %v756_v37 = vand.u32 2147483647, %v745_v25  ;;  %vm752_vm12 = vweird.f32 %v745_v25 }
 0x219   : > { %2007 = vrcp.f32 %v746_v26  ;;  %v773_v38 = vand.u32 2147483648, %v746_v26  ;;  %v771_v27 = vand.u32 2147483647, %v746_v26  ;;  %vm767_vm14 = vweird.f32 %v746_v26 }
 0x21a   : > { %v759_v41 = vor.u32 1.1754944e-38, %v758_v34  ;;  %vm757_vm15 = vcmp.eq.f32.partialorder %v756_v37, 8.507059e+37 }
 0x21b   : > { %v774_v44 = vor.u32 1.1754944e-38, %v773_v38  ;;  %vm772_vm2 = vcmp.eq.f32.partialorder %v771_v27, 8.507059e+37 }
 0x21e   : > { %v2006_v28 = vpop.eup %2005 }
 0x21f   : > { %v2008_v30 = vpop.eup %2007  ;;  %v748_v31 = vmul.f32 %v2006_v28, %v745_v25  ;;  %vm753_vm10 = vweird.f32 %v2006_v28 }
 0x220   : > { %v763_v32 = vmul.f32 %v2008_v30, %v746_v26  ;;  %vm768_vm11 = vweird.f32 %v2008_v30  ;;  %vm754_vm13 = vmor %vm752_vm12, %vm753_vm10 }
 0x221   : > { %v749_v33 = vsub.f32 1.0, %v748_v31  ;;  %vm769_vm1 = vmor %vm767_vm14, %vm768_vm11  ;;  %v1533_v31 = vld [vmem:[%s2550_s14] sm:$0xff] }
 0x222   : > { %v764_v35 = vsub.f32 1.0, %v763_v32 }
 0x223   : > { %v750_v36 = vmul.f32 %v2006_v28, %v749_v33 }
 0x224   : > { %v765_v39 = vmul.f32 %v2008_v30, %v764_v35 }
 0x225   : > { %v751_v40 = vadd.f32 %v2006_v28, %v750_v36 }
 0x226   : > { %v766_v42 = vadd.f32 %v2008_v30, %v765_v39 }
 0x227   : > { %v755_v43 = vsel %vm754_vm13, %v2006_v28, %v751_v40 }
 0x228   : > { %v760_v45 = vsel %vm757_vm15, %v759_v41, %v755_v43  ;;  %v770_v46 = vsel %vm769_vm1, %v2008_v30, %v766_v42 }
 0x229   : > { %v775_v29 = vsel %vm772_vm2, %v774_v44, %v770_v46  ;;  %v777_v47 = vmul.f32 %v760_v45, %v737_v18 }
 0x22a   : > { %v778_v48 = vmul.f32 %v775_v29, %v738_v19 }
 0x22b   : > { %1556 = vmatpush.msra.mxu0 %v777_v47 }
 0x22c   : > { %1579 = vmatpush.msra.mxu1 %v778_v48  ;;  %1873 = vmatmul.msk.f32.vlgmr.msra.gmra.mxu0 %vm783_vm9, %v1533_v31 }
 0x22d   : > { %1875 = vmatmul.msk.f32.vlgmr.msra.gmra.mxu1 %vm783_vm9, %v1533_v31 }
 0x249   : > { %v997_v55 = vpop.f32.mrf.mxu0 }
 0x260   : > { %v940_v50 = vpop.f32.mrf.mxu2  ;;  %v960_v51 = vpop.f32.mrf.mxu3 }
 0x261   : > { %v998_v61 = vadd.f32 %v997_v55, %v940_v50 }
 0x262   : > { %v1017_v56 = vpop.f32.mrf.mxu1 }
 0x263   : > { %v1018_v62 = vadd.f32 %v1017_v56, %v960_v51 }
 0x268   : > { %v1069_v53 = vpop.f32.mrf.mxu2 }
 0x269   : > { %v1089_v54 = vpop.f32.mrf.mxu3  ;;  %v1092_v63 = vadd.f32 %v1069_v53, %v998_v61  ;;  %v1532_v61 = vld [vmem:[%s2549_s13 + $0x8] sm:$0xff] }
 0x26a   : > { %v1093_v0 = vadd.f32 %v1089_v54, %v1018_v62 }
 0x270   : > { %v1185_v57 = vpop.f32.mrf.mxu2 }
 0x272   : > { %v1205_v58 = vpop.f32.mrf.mxu3  ;;  %v1140_v59 = vpop.f32.mrf.mxu0 }
 0x273   : > { %v1160_v60 = vpop.f32.mrf.mxu1  ;;  %v1163_v1 = vadd.f32 %v1140_v59, %v1092_v63  ;;  %v1531_v59 = vld [vmem:[%s2549_s13] sm:$0xff] }
 0x274   : > { %v1164_v2 = vadd.f32 %v1160_v60, %v1093_v0 }
 0x275   : > { %v1208_v5 = vadd.f32 %v1185_v57, %v1163_v1 }
 0x276   : > { %v1209_v6 = vadd.f32 %v1205_v58, %v1164_v2 }
 0x27a   : > { %v1254_v3 = vpop.f32.mrf.mxu0  ;;  %v1323_v7 = vpop.f32.mrf.mxu2 }
 0x27b   : > { %v1274_v4 = vpop.f32.mrf.mxu1  ;;  %v1343_v9 = vpop.f32.mrf.mxu3  ;;  %v1277_v10 = vadd.f32 %v1254_v3, %v1208_v5 }
 0x27c   : > { %v1278_v11 = vadd.f32 %v1274_v4, %v1209_v6  ;;  %v1660_v4 = vpop.permute.xlu2 %1659 }
 0x27d   : > { %v1346_v12 = vadd.f32 %v1323_v7, %v1277_v10 }
 0x27e   : > { %v1347_v13 = vadd.f32 %v1343_v9, %v1278_v11 }
 0x282   : > { %v1379_v14 = vpop.f32.mrf.mxu0  ;;  %v1448_v18 = vpop.f32.mrf.mxu2 }
 0x283   : > { %v1399_v15 = vpop.f32.mrf.mxu1  ;;  %v1402_v16 = vadd.f32 %v1379_v14, %v1346_v12  ;;  %v1468_v19 = vpop.f32.mrf.mxu3 }
 0x284   : > { %v1403_v17 = vadd.f32 %v1399_v15, %v1347_v13 }
 0x285   : > { %v1471_v20 = vadd.f32 %v1448_v18, %v1402_v16  ;;  %v1651_v16 = vpop.permute.xlu1 %1650 }
 0x286   : > { %v1472_v21 = vadd.f32 %v1468_v19, %v1403_v17 }
 0x287   : > { %v1480_v22 = vmul.f32 %v2432_v8, %v1471_v20 }
 0x288   : > { %v1481_v23 = vmul.f32 %v2432_v8, %v1472_v21  ;;  %v1534_v8 = vld [vmem:[%s2550_s14 + $0x8] sm:$0xff] }
 0x289   : > { %v1487_v25 = vadd.f32 %v1485_v24, %v1480_v22  ;;  %1874 = vmatmul.msk.f32.gmra.mxu0 %vm783_vm9, %v1534_v8  ;;  %1876 = vmatmul.msk.f32.gmra.mxu1 %vm783_vm9, %v1534_v8 }
 0x28a   : > { %v1488_v26 = vadd.f32 %v1485_v24, %v1481_v23 }
 0x28b   : > { %v1871_v28 = vmul.f32 -1.442695, %v1487_v25 }
 0x28c   : > { %v1872_v30 = vmul.f32 -1.442695, %v1488_v26 }
 0x28d   : > { %2009 = vpow2.f32 %v1871_v28 }
 0x28e   : > { %2011 = vpow2.f32 %v1872_v30 }
 0x293   : > { %v2010_v32 = vpop.eup %2009 }
 0x294   : > { %v2012_v33 = vpop.eup %2011  ;;  %v1495_v34 = vadd.f32 1.0, %v2010_v32 }
 0x295   : > { %v1496_v35 = vadd.f32 1.0, %v2012_v33 }
 0x296   : > { %2013 = vrcp.f32 %v1495_v34  ;;  %v1508_v40 = vand.u32 2147483648, %v1495_v34  ;;  %v1506_v43 = vand.u32 2147483647, %v1495_v34  ;;  %vm1502_vm5 = vweird.f32 %v1495_v34 }
 0x297   : > { %2015 = vrcp.f32 %v1496_v35  ;;  %v1523_v44 = vand.u32 2147483648, %v1496_v35  ;;  %v1521_v46 = vand.u32 2147483647, %v1496_v35  ;;  %vm1517_vm7 = vweird.f32 %v1496_v35 }
 0x298   : > { %v1509_v47 = vor.u32 1.1754944e-38, %v1508_v40  ;;  %vm1507_vm8 = vcmp.eq.f32.partialorder %v1506_v43, 8.507059e+37 }
 0x299   : > { %v1524_v51 = vor.u32 1.1754944e-38, %v1523_v44  ;;  %vm1522_vm10 = vcmp.eq.f32.partialorder %v1521_v46, 8.507059e+37 }
 0x29c   : > { %v2014_v36 = vpop.eup %2013 }
 0x29d   : > { %v2016_v37 = vpop.eup %2015  ;;  %v1498_v38 = vmul.f32 %v2014_v36, %v1495_v34  ;;  %vm1503_vm3 = vweird.f32 %v2014_v36 }
 0x29e   : > { %v1513_v39 = vmul.f32 %v2016_v37, %v1496_v35  ;;  %vm1518_vm4 = vweird.f32 %v2016_v37  ;;  %vm1504_vm6 = vmor %vm1502_vm5, %vm1503_vm3 }
 0x29f   : > { %v1499_v27 = vsub.f32 1.0, %v1498_v38  ;;  %vm1519_vm0 = vmor %vm1517_vm7, %vm1518_vm4 }
 0x2a0   : > { %v1514_v41 = vsub.f32 1.0, %v1513_v39 }
 0x2a1   : > { %v1500_v42 = vmul.f32 %v2014_v36, %v1499_v27 }
 0x2a2   : > { %v1515_v45 = vmul.f32 %v2016_v37, %v1514_v41 }
 0x2a3   : > { %v1501_v29 = vadd.f32 %v2014_v36, %v1500_v42 }
 0x2a4   : > { %v1516_v48 = vadd.f32 %v2016_v37, %v1515_v45 }
 0x2a5   : > { %v1505_v50 = vsel %vm1504_vm6, %v2014_v36, %v1501_v29 }
 0x2a6   : > { %v1510_v53 = vsel %vm1507_vm8, %v1509_v47, %v1505_v50  ;;  %v1520_v54 = vsel %vm1519_vm0, %v2016_v37, %v1516_v48 }
 0x2a7   : > { %v1527_v55 = vmul.f32 %v1510_v53, %v1487_v25  ;;  %v1525_v56 = vsel %vm1522_vm10, %v1524_v51, %v1520_v54 }
 0x2a8   : > { %v1528_v57 = vmul.f32 %v1525_v56, %v1488_v26 }
 0x2a9   : > { %v1529_v58 = vadd.f32 %v1527_v55, %v2295_v49  ;;  %v1558_v49 = vpop.f32.mrf.mxu0 }
 0x2aa   : > { %v1530_v60 = vadd.f32 %v1528_v57, %v2303_v52  ;;  %v1581_v62 = vpop.f32.mrf.mxu1  ;;  %v1646_v52 = vpop.permute.xlu0 %1645 }
 0x2ab   : > { %1608 = vmatpush.msra.mxu2 %v1529_v58 }
 0x2ac   : > { %1631 = vmatpush.msra.mxu3 %v1530_v60  ;;  %1877 = vmatmul.msk.f32.vlgmr.msra.gmra.mxu2 %vm783_vm9, %v1531_v59 }
 0x2ad   : > { %1879 = vmatmul.msk.f32.vlgmr.msra.gmra.mxu3 %vm783_vm9, %v1531_v59 }
 0x2b2   : > { %v1665_v19 = vpop.permute.xlu0 %1664 }
 0x2b4   : > { %1878 = vmatmul.msk.f32.gmra.mxu2 %vm783_vm9, %v1532_v61 }
 0x2b5   : > { %1880 = vmatmul.msk.f32.gmra.mxu3 %vm783_vm9, %v1532_v61 }
 0x306   : > { %v1561_v9 = vpop.f32.mrf.mxu0  ;;  %v1584_v11 = vpop.f32.mrf.mxu1 }
 0x32f   : > { %v1610_v63 = vpop.f32.mrf.mxu2 }
 0x330   : > { %v1611_v0 = vadd.f32 %v1610_v63, %v1558_v49  ;;  %v1633_v1 = vpop.f32.mrf.mxu3 }
 0x331   : > { %v1634_v2 = vadd.f32 %v1633_v1, %v1581_v62 }
 0x332   : > { %v1653_v3 = vmul.f32 %v1646_v52, %v1611_v0 }
 0x333   : > { %v1654_v5 = vmul.f32 %v1646_v52, %v1634_v2 }
 0x334   : > { %v2469_v6 = vadd.f32 %v1660_v4, %v1653_v3 }
 0x335   : > { %v2471_v7 = vadd.f32 %v1660_v4, %v1654_v5 }
 0x336   : > { %v1881_v10 = vmul.f32 -1.442695, %v2469_v6 }
 0x337   : > { %v1882_v12 = vmul.f32 -1.442695, %v2471_v7  ;;  %v1613_v13 = vpop.f32.mrf.mxu2 }
 0x338   : > { %2017 = vpow2.f32 %v1881_v10  ;;  %v1614_v14 = vadd.f32 %v1613_v13, %v1561_v9  ;;  %v1636_v15 = vpop.f32.mrf.mxu3 }
 0x339   : > { %2019 = vpow2.f32 %v1882_v12  ;;  %v1637_v17 = vadd.f32 %v1636_v15, %v1584_v11 }
 0x33a   : > { %v1655_v18 = vmul.f32 %v1651_v16, %v1614_v14 }
 0x33b   : > { %v1656_v20 = vmul.f32 %v1651_v16, %v1637_v17 }
 0x33c   : > { %v2475_v21 = vadd.f32 %v1665_v19, %v1655_v18 }
 0x33d   : > { %v2477_v22 = vadd.f32 %v1665_v19, %v1656_v20 }
 0x33e   : > { %v2018_v23 = vpop.eup %2017  ;;  %v1883_v24 = vmul.f32 -1.442695, %v2475_v21 }
 0x33f   : > { %v2020_v25 = vpop.eup %2019  ;;  %v1683_v26 = vadd.f32 1.0, %v2018_v23  ;;  %v1884_v28 = vmul.f32 -1.442695, %v2477_v22 }
 0x340   : > { %v1684_v30 = vadd.f32 1.0, %v2020_v25  ;;  %2021 = vpow2.f32 %v1883_v24 }
 0x341   : > { %2023 = vrcp.f32 %v1683_v26  ;;  %v1696_v39 = vand.u32 2147483647, %v1683_v26  ;;  %v1698_v27 = vand.u32 2147483648, %v1683_v26  ;;  %vm1692_vm12 = vweird.f32 %v1683_v26 }
 0x342   : > { %2025 = vrcp.f32 %v1684_v30  ;;  %v1713_v42 = vand.u32 2147483648, %v1684_v30  ;;  %v1711_v44 = vand.u32 2147483647, %v1684_v30  ;;  %vm1707_vm14 = vweird.f32 %v1684_v30 }
 0x343   : > { %2027 = vpow2.f32 %v1884_v28  ;;  %v1699_v29 = vor.u32 1.1754944e-38, %v1698_v27  ;;  %vm1697_vm15 = vcmp.eq.f32.partialorder %v1696_v39, 8.507059e+37 }
 0x344   : > { %v1714_v50 = vor.u32 1.1754944e-38, %v1713_v42  ;;  %vm1712_vm2 = vcmp.eq.f32.partialorder %v1711_v44, 8.507059e+37 }
 0x346   : > { %v2022_v31 = vpop.eup %2021 }
 0x347   : > { %v2024_v32 = vpop.eup %2023  ;;  %v1685_v33 = vadd.f32 1.0, %v2022_v31 }
 0x348   : > { %v2026_v34 = vpop.eup %2025  ;;  %v1688_v35 = vmul.f32 %v2024_v32, %v1683_v26  ;;  %vm1693_vm9 = vweird.f32 %v2024_v32 }
 0x349   : > { %v2028_v8 = vpop.eup %2027  ;;  %v1703_v36 = vmul.f32 %v2026_v34, %v1684_v30  ;;  %2029 = vrcp.f32 %v1685_v33  ;;  %vm1708_vm11 = vweird.f32 %v2026_v34  ;;  %vm1694_vm13 = vmor %vm1692_vm12, %vm1693_vm9  ;;  %v1728_v60 = vand.u32 2147483648, %v1685_v33 }
 0x34a   : > { %v1689_v37 = vsub.f32 1.0, %v1688_v35  ;;  %v2481_v38 = vadd.f32 1.0, %v2028_v8  ;;  %vm1709_vm1 = vmor %vm1707_vm14, %vm1708_vm11  ;;  %v1726_v62 = vand.u32 2147483647, %v1685_v33  ;;  %vm1722_vm4 = vweird.f32 %v1685_v33 }
 0x34b   : > { %v1704_v40 = vsub.f32 1.0, %v1703_v36  ;;  %v1729_v52 = vor.u32 1.1754944e-38, %v1728_v60 }
 0x34c   : > { %v1690_v41 = vmul.f32 %v2024_v32, %v1689_v37  ;;  %2031 = vrcp.f32 %v2481_v38  ;;  %v1743_v1 = vand.u32 2147483648, %v2481_v38  ;;  %v1741_v3 = vand.u32 2147483647, %v2481_v38 }
 0x34d   : > { %v1705_v43 = vmul.f32 %v2026_v34, %v1704_v40  ;;  %vm1727_vm7 = vcmp.eq.f32.partialorder %v1726_v62, 8.507059e+37  ;;  %vm1737_vm8 = vweird.f32 %v2481_v38 }
 0x34e   : > { %v1691_v45 = vadd.f32 %v2024_v32, %v1690_v41  ;;  %v1744_v9 = vor.u32 1.1754944e-38, %v1743_v1  ;;  %vm1742_vm10 = vcmp.eq.f32.partialorder %v1741_v3, 8.507059e+37 }
 0x34f   : > { %v2030_v46 = vpop.eup %2029  ;;  %v1706_v47 = vadd.f32 %v2026_v34, %v1705_v43 }
 0x350   : > { %v1695_v48 = vsel %vm1694_vm13, %v2024_v32, %v1691_v45  ;;  %v1718_v51 = vmul.f32 %v2030_v46, %v1685_v33  ;;  %vm1723_vm3 = vweird.f32 %v2030_v46 }
 0x351   : > { %v1700_v53 = vsel %vm1697_vm15, %v1699_v29, %v1695_v48  ;;  %v1710_v54 = vsel %vm1709_vm1, %v2026_v34, %v1706_v47  ;;  %vm1724_vm5 = vmor %vm1722_vm4, %vm1723_vm3 }
 0x352   : > { %v2032_v55 = vpop.eup %2031  ;;  %v1747_v56 = vmul.f32 %v1700_v53, %v2469_v6  ;;  %v1715_v57 = vsel %vm1712_vm2, %v1714_v50, %v1710_v54  ;;  %v1719_v58 = vsub.f32 1.0, %v1718_v51 }
 0x353   : > { %v1748_v59 = vmul.f32 %v1715_v57, %v2471_v7  ;;  %v1733_v61 = vmul.f32 %v2032_v55, %v2481_v38  ;;  %vm1738_vm6 = vweird.f32 %v2032_v55 }
 0x354   : > { %1751 = vst [vmem:[%s2490_s27] sm:$0xff] %v1747_v56  ;;  %v1720_v49 = vmul.f32 %v2030_v46, %v1719_v58  ;;  %vm1739_vm0 = vmor %vm1737_vm8, %vm1738_vm6 }
 0x355   : > { %1752 = vst [vmem:[%s2490_s27 + $0x8] sm:$0xff] %v1748_v59  ;;  %v1734_v63 = vsub.f32 1.0, %v1733_v61 }
 0x356   : > { %v1721_v0 = vadd.f32 %v2030_v46, %v1720_v49 }
 0x357   : > { %v1735_v2 = vmul.f32 %v2032_v55, %v1734_v63 }
 0x358   : > { %v1725_v4 = vsel %vm1724_vm5, %v2030_v46, %v1721_v0 }
 0x359   : > { %v1730_v5 = vsel %vm1727_vm7, %v1729_v52, %v1725_v4  ;;  %v1736_v6 = vadd.f32 %v2032_v55, %v1735_v2 }
 0x35a   : > { %v1749_v7 = vmul.f32 %v1730_v5, %v2475_v21 }
 0x35b   : > { %v1740_v10 = vsel %vm1739_vm0, %v2032_v55, %v1736_v6 }
 0x35c   : > { %1753 = vst [vmem:[%s2490_s27 + $0x10] sm:$0xff] %v1749_v7  ;;  %v1745_v11 = vsel %vm1742_vm10, %v1744_v9, %v1740_v10 }
 0x35d   : > { %v1750_v12 = vmul.f32 %v1745_v11, %v2477_v22 }
 0x35f   : > { %1754 = vst [vmem:[%s2490_s27 + $0x18] sm:$0xff] %v1750_v12 }
 0x360   : > { %2060 = shalt.err (!%p2057_p3)
}
 0x361   : > { %s2107_s20 = smov 256   ;;  %s2578_s27 = smov 16  }
 0x362   : > { %1892 = dma.vmem_to_hbm [thread:$0]  (%p2241_p5), %s1769_s0, 512, %s1771_s21, %s1756_s23, %s2107_s20, %s2107_s20, %s2578_s27  }
 0x363 PF: > { %s2579_s3 = sld [smem:[#allocation5_spill]]  ;;  %p1898_p4 = scmp.ge.s32.totalorder %s2095_s30, 2 }
 0x365   : > { %p1895_p7 = pnand %p1898_p4, %p2245_p6 }
 0x367   : > { %p1896_p8 = pneg %p1895_p7 }
 0x369   : > { %s1785_s29 = sand.u32 1, %s2579_s3  }
 0x36a   : > { %s1786_s25 = scalar_lea.sflag [#allocation3], %s1785_s29 }
 0x36b   : > { %2078 = dma.done.wait (%p1896_p8), %s1786_s25, 512  }
 0x36c   : > { %2080 = vsyncadd (%p1896_p8), %s1786_s25, 4294966784  ;;  %s2581_s30 = sld [smem:[#allocation7_spill]]  ;;  %s2584_s27 = smov %s2087_s28 }
 0x36d   : > { %s2582_s19 = sld [smem:[#allocation6_spill]] }
 0x36e   : > { %s2583_s29 = sld [smem:[#allocation8_spill]] }
 0x372   : > { %p28_p9 = scmp.ge.s32.totalorder %s2581_s30, 4  }
 0x373   : > { %s2585_s28 = smov %s2582_s19 }
 0x374   :  { %30 = sbr.rel (!%p28_p9) target bundleno = 9 (0x9), region = 128 }
 0x379   :  { %1792 = vsyncpa [#allocation3], 1 }
 0x37a   :  { %1794 = vsyncpa [#allocation3 + $0x1], 1 }

</bundles_post_ra>
